<compile_context>
chip_gen: v7x
topology: tpu7x:2x2x1
jax: 0.10.0
libtpu: 0.0.40
codegen_flags: <defaults>
</compile_context>

<pallas_src>
import jax
import jax.numpy as jnp
from jax import lax
from jax.experimental import pallas as pl
from jax.experimental.pallas import tpu as pltpu


# -----------------------------------------------------------------------------
# Fused C2f kernel (one grid step == one batch element)
# -----------------------------------------------------------------------------
def make_c2f_kernel(n_bn, c, cp, H, W, padl, shortcut):
    HW = H * W

    def kernel(*refs):
        # inputs
        x_ref, w1a_ref, b1a_ref, w1b_ref, b1b_ref = refs[:5]
        m_refs = refs[5:5 + 4 * n_bn]
        base = 5 + 4 * n_bn
        w2_ref = refs[base]            # (c2, (2+n)*cp)  chunk-padded 1x1 weights
        b2_ref = refs[base + 1]        # (c2, 1)
        # output + scratch
        o_ref = refs[base + 2]
        vpad_ref = refs[base + 3]      # (c, padl + HW + W + 1) flattened halo buf
        col_ref = refs[base + 4]       # (9*cp, HW) im2col buf
        cat_ref = refs[base + 5]       # ((2+n)*cp, HW) concat buf for cv2

        x = x_ref[0]                   # (c1, HW)

        # Zero the scratches once per grid step; only interiors / data rows are
        # rewritten below, so halo / channel-pad regions stay zero.
        vpad_ref[...] = jnp.zeros_like(vpad_ref)
        col_ref[...] = jnp.zeros_like(col_ref)
        cat_ref[...] = jnp.zeros_like(cat_ref)

        # Column-boundary masks for the +-1 horizontal taps, hoisted out of all
        # conv calls (shape (c, HW), broadcast once).
        w_idx = lax.broadcasted_iota(jnp.int32, (c, HW), 1) % W
        not_left = w_idx != 0
        not_right = w_idx != (W - 1)

        def silu(v):
            return v * jax.nn.sigmoid(v)          # sigmoid -> EUP slot

        def conv1x1(v, w_ref, b_ref):
            return (jnp.dot(w_ref[...], v, preferred_element_type=jnp.float32)
                    + b_ref[...])

        def conv3x3(v, w_ref, b_ref):
            # v: (c, HW).  Write interior into the flattened zero-halo scratch
            # (128-aligned lane offset -> unmasked lane-dense store), gather
            # the 9 tap shifts as contiguous lane slices + boundary masks, then
            # ONE MXU dot with K = 9*cp.
            vpad_ref[:, padl:padl + HW] = v
            for dh in range(3):
                for dw in range(3):
                    t = dh * 3 + dw
                    s = (dh - 1) * W + (dw - 1)
                    sh = vpad_ref[:, padl + s:padl + s + HW]
                    if dw == 0:
                        sh = jnp.where(not_left, sh, 0.0)
                    elif dw == 2:
                        sh = jnp.where(not_right, sh, 0.0)
                    col_ref[t * cp:t * cp + c, :] = sh       # 8-aligned offset
            return (jnp.dot(w_ref[...], col_ref[...],
                            preferred_element_type=jnp.float32) + b_ref[...])

        # cv1 (1x1 + SiLU), already split into the two chunks via the weights.
        y0 = silu(conv1x1(x, w1a_ref, b1a_ref))
        y1 = silu(conv1x1(x, w1b_ref, b1b_ref))
        cat_ref[0:c, :] = y0
        cat_ref[cp:cp + c, :] = y1

        # Bottleneck chain; each stage's output is dropped into the concat
        # buffer at an 8-aligned sublane offset as it is produced.
        y_last = y1
        for i in range(n_bn):
            mw1, mb1, mw2, mb2 = m_refs[4 * i:4 * i + 4]
            t1 = silu(conv3x3(y_last, mw1, mb1))
            t2 = silu(conv3x3(t1, mw2, mb2))
            y_last = y_last + t2 if shortcut else t2
            cat_ref[(2 + i) * cp:(2 + i) * cp + c, :] = y_last

        # cv2 (1x1 over the concat): single MXU dot, K = (2+n)*cp.
        o_ref[0] = silu(jnp.dot(w2_ref[...], cat_ref[...],
                                preferred_element_type=jnp.float32)
                        + b2_ref[...]).astype(o_ref.dtype)

    return kernel


# -----------------------------------------------------------------------------
# Wrapper: BN already folded; re-layout weights (tiny), wire pallas_call
# -----------------------------------------------------------------------------
def c2f_forward(x_nchw, params, shortcut=True):
    n = len(params["m_w1"])
    N, C1, H, W = x_nchw.shape
    HW = H * W
    c = params["cv1_w"].shape[0] // 2
    c2 = params["cv2_w"].shape[0]
    cp = ((c + 7) // 8) * 8                       # per-chunk channel rows, 8-aligned
    padl = ((W + 1 + 127) // 128) * 128           # aligned left halo width

    x = x_nchw.reshape(N, C1, HW).astype(jnp.float32)   # NCHW -> (N, C, HW), free

    # --- weight re-layout (weights only; one-time, negligible) ---
    cv1_w = params["cv1_w"][:, :, 0, 0]                  # (2c, c1)
    inputs = [x,
              cv1_w[:c], params["cv1_b"][:c].reshape(c, 1),
              cv1_w[c:], params["cv1_b"][c:].reshape(c, 1)]

    def taps(w_oihw):
        # (co, ci, 3, 3) -> (co, 9*cp) matching im2col row order t*cp + ci.
        co, ci = w_oihw.shape[0], w_oihw.shape[1]
        t = jnp.transpose(w_oihw, (0, 2, 3, 1)).reshape(co, 9, ci)
        t = jnp.pad(t, ((0, 0), (0, 0), (0, cp - ci)))
        return t.reshape(co, 9 * cp)

    for i in range(n):
        inputs += [taps(params["m_w1"][i]), params["m_b1"][i].reshape(c, 1),
                   taps(params["m_w2"][i]), params["m_b2"][i].reshape(c, 1)]

    # cv2 1x1 weights, chunk-padded to match the (2+n)*cp concat-buffer rows.
    cv2_w = params["cv2_w"][:, :, 0, 0]                  # (c2, (2+n)c)
    w2 = jnp.concatenate(
        [jnp.pad(cv2_w[:, i * c:(i + 1) * c], ((0, 0), (0, cp - c)))
         for i in range(2 + n)], axis=1)                 # (c2, (2+n)*cp)
    inputs += [w2, params["cv2_b"].reshape(c2, 1)]

    def full_spec(a):
        nd = a.ndim
        return pl.BlockSpec(a.shape, lambda nn, _nd=nd: (0,) * _nd)

    in_specs = [pl.BlockSpec((1, C1, HW), lambda nn: (nn, 0, 0))]
    in_specs += [full_spec(a) for a in inputs[1:]]

    kernel = make_c2f_kernel(n, c, cp, H, W, padl, shortcut)

    # Rough scoped-VMEM requirement (double-buffered blocks + weights + scratch
    # + headroom for live activation values), clamped to v7x physical VMEM.
    block_bytes = (C1 * HW + c2 * HW) * 4
    weight_bytes = sum(int(a.size) * 4 for a in inputs[1:])
    scratch_bytes = (c * (padl + HW + W + 1) + 9 * cp * HW + (2 + n) * cp * HW) * 4
    est = 2 * (block_bytes + weight_bytes) + scratch_bytes
    vmem_limit = int(min(max(4 * est, 32 * (1 << 20)), 64 * (1 << 20)))

    out = pl.pallas_call(
        kernel,
        out_shape=jax.ShapeDtypeStruct((N, c2, HW), jnp.float32),
        grid=(N,),
        in_specs=in_specs,
        out_specs=pl.BlockSpec((1, c2, HW), lambda nn: (nn, 0, 0)),
        scratch_shapes=[
            pltpu.VMEM((c, padl + HW + W + 1), jnp.float32),   # flattened halo
            pltpu.VMEM((9 * cp, HW), jnp.float32),             # im2col
            pltpu.VMEM(((2 + n) * cp, HW), jnp.float32),       # concat for cv2
        ],
        compiler_params=pltpu.CompilerParams(
            dimension_semantics=("parallel",),
            vmem_limit_bytes=vmem_limit),
    )(*inputs)

    return out.reshape(N, c2, H, W)


# -----------------------------------------------------------------------------
# Pure-JAX reference (lax.conv) for verification
# -----------------------------------------------------------------------------
def reference_forward(x_nchw, params, shortcut=True):
    n = len(params["m_w1"])
    dn = ("NCHW", "OIHW", "NCHW")
    silu = lambda v: v * jax.nn.sigmoid(v)

    def conv(inp, w, b, pad):
        r = lax.conv_general_dilated(inp.astype(jnp.float32), w, (1, 1),
                                     ((pad, pad), (pad, pad)),
                                     dimension_numbers=dn,
                                     precision=lax.Precision.HIGHEST)
        return r + b.reshape(1, -1, 1, 1)

    y_full = silu(conv(x_nchw, params["cv1_w"], params["cv1_b"], 0))
    c = y_full.shape[1] // 2
    ys = [y_full[:, :c], y_full[:, c:]]
    for i in range(n):
        t = silu(conv(ys[-1], params["m_w1"][i], params["m_b1"][i], 1))
        u = silu(conv(t, params["m_w2"][i], params["m_b2"][i], 1))
        ys.append(ys[-1] + u if shortcut else u)
    cat = jnp.concatenate(ys, axis=1)
    return silu(conv(cat, params["cv2_w"], params["cv2_b"], 0))


# -----------------------------------------------------------------------------
# Deterministic synthetic parameters (Conv+BN folded, inference mode)
# -----------------------------------------------------------------------------
def fold_bn(w_oihw, gamma, beta, mean, var, eps=1e-5):
    t = gamma / jnp.sqrt(var + eps)
    return w_oihw * t[:, None, None, None], beta - mean * t


def make_conv_params(key, cin, cout, k):
    kw, k1, k2, k3, k4 = jax.random.split(key, 5)
    w = 0.2 * jax.random.normal(kw, (cout, cin, k, k), jnp.float32)
    gamma = 0.5 + jax.random.uniform(k1, (cout,), jnp.float32)
    beta = 0.1 * jax.random.normal(k2, (cout,), jnp.float32)
    mean = 0.1 * jax.random.normal(k3, (cout,), jnp.float32)
    var = 0.5 + jax.random.uniform(k4, (cout,), jnp.float32)
    return fold_bn(w, gamma, beta, mean, var)


def make_params(key, c1, c2, n=1, e=0.5):
    c = int(c2 * e)
    keys = jax.random.split(key, 2 + 2 * n)
    cv1_w, cv1_b = make_conv_params(keys[0], c1, 2 * c, 1)
    cv2_w, cv2_b = make_conv_params(keys[1], (2 + n) * c, c2, 1)
    m_w1, m_b1, m_w2, m_b2 = [], [], [], []
    for i in range(n):
        w1, b1 = make_conv_params(keys[2 + 2 * i], c, c, 3)
        w2, b2 = make_conv_params(keys[3 + 2 * i], c, c, 3)
        m_w1.append(w1); m_b1.append(b1); m_w2.append(w2); m_b2.append(b2)
    return {"cv1_w": cv1_w, "cv1_b": cv1_b,
            "m_w1": m_w1, "m_b1": m_b1, "m_w2": m_w2, "m_b2": m_b2,
            "cv2_w": cv2_w, "cv2_b": cv2_b}


if __name__ == "__main__":
    key = jax.random.PRNGKey(0)
    kx, kp = jax.random.split(key)

    N, C, H, W = 2, 4, 16, 16        # c1 = c2 = 4, e = 0.5 -> hidden c = 2
    n_bottleneck = 1
    shortcut = True                  # exercise the Bottleneck residual path

    x = jax.random.normal(kx, (N, C, H, W), jnp.float32)
    params = make_params(kp, C, C, n=n_bottleneck, e=0.5)

    fwd = jax.jit(lambda xx, pp: c2f_forward(xx, pp, shortcut=shortcut))
    out = jax.block_until_ready(fwd(x, params))
    ref = jax.block_until_ready(reference_forward(x, params, shortcut=shortcut))

    assert out.shape == (N, C, H, W) and out.dtype == jnp.float32
    err = float(jnp.max(jnp.abs(out - ref)))
    assert jnp.allclose(out, ref, atol=1e-4, rtol=1e-4), f"max abs err {err}"
    print("KERNEL_OK")
</pallas_src>

<mosaic_0001>
module attributes {stable_mosaic.version = 11 : i64} {
  func.func @kernel(%arg0: i32, %arg1: memref<1x4x256xf32, #tpu.memory_space<vmem>>, %arg2: memref<2x4xf32, #tpu.memory_space<vmem>>, %arg3: memref<2x1xf32, #tpu.memory_space<vmem>>, %arg4: memref<2x4xf32, #tpu.memory_space<vmem>>, %arg5: memref<2x1xf32, #tpu.memory_space<vmem>>, %arg6: memref<2x72xf32, #tpu.memory_space<vmem>>, %arg7: memref<2x1xf32, #tpu.memory_space<vmem>>, %arg8: memref<2x72xf32, #tpu.memory_space<vmem>>, %arg9: memref<2x1xf32, #tpu.memory_space<vmem>>, %arg10: memref<4x24xf32, #tpu.memory_space<vmem>>, %arg11: memref<4x1xf32, #tpu.memory_space<vmem>>, %arg12: memref<1x4x256xf32, #tpu.memory_space<vmem>>, %arg13: memref<2x401xf32, #tpu.memory_space<vmem>>, %arg14: memref<72x256xf32, #tpu.memory_space<vmem>>, %arg15: memref<24x256xf32, #tpu.memory_space<vmem>>) attributes {dimension_semantics = [#tpu.dimension_semantics<parallel>], iteration_bounds = array<i64: 2>, scalar_prefetch = 0 : i64, scratch_operands = 3 : i64, tpu.core_type = #tpu.core_type<tc>, window_params = [{transform_indices = @transform_0, window_bounds = array<i64: 1, 4, 256>}, {pipeline_mode = #tpu.pipeline_mode<synchronous>, transform_indices = @transform_1, window_bounds = array<i64: 2, 4>}, {pipeline_mode = #tpu.pipeline_mode<synchronous>, transform_indices = @transform_2, window_bounds = array<i64: 2, 1>}, {pipeline_mode = #tpu.pipeline_mode<synchronous>, transform_indices = @transform_3, window_bounds = array<i64: 2, 4>}, {pipeline_mode = #tpu.pipeline_mode<synchronous>, transform_indices = @transform_4, window_bounds = array<i64: 2, 1>}, {pipeline_mode = #tpu.pipeline_mode<synchronous>, transform_indices = @transform_5, window_bounds = array<i64: 2, 72>}, {pipeline_mode = #tpu.pipeline_mode<synchronous>, transform_indices = @transform_6, window_bounds = array<i64: 2, 1>}, {pipeline_mode = #tpu.pipeline_mode<synchronous>, transform_indices = @transform_7, window_bounds = array<i64: 2, 72>}, {pipeline_mode = #tpu.pipeline_mode<synchronous>, transform_indices = @transform_8, window_bounds = array<i64: 2, 1>}, {pipeline_mode = #tpu.pipeline_mode<synchronous>, transform_indices = @transform_9, window_bounds = array<i64: 4, 24>}, {pipeline_mode = #tpu.pipeline_mode<synchronous>, transform_indices = @transform_10, window_bounds = array<i64: 4, 1>}, {transform_indices = @transform_11, window_bounds = array<i64: 1, 4, 256>}]} {
    %c0 = arith.constant 0 : index
    %c0_0 = arith.constant 0 : index
    %c0_1 = arith.constant 0 : index
    %0 = vector.load %arg1[%c0, %c0_0, %c0_1] : memref<1x4x256xf32, #tpu.memory_space<vmem>>, vector<1x4x256xf32>
    %1 = vector.shape_cast %0 : vector<1x4x256xf32> to vector<4x256xf32>
    %cst = arith.constant 0.000000e+00 : f32
    %2 = vector.broadcast %cst : f32 to vector<2x401xf32>
    %c0_2 = arith.constant 0 : index
    %c0_3 = arith.constant 0 : index
    %3 = vector.load %arg13[%c0_2, %c0_3] : memref<2x401xf32, #tpu.memory_space<vmem>>, vector<2x401xf32>
    tpu.vector_store %arg13[%c0_2, %c0_3], %2 {strides = array<i32>} : memref<2x401xf32, #tpu.memory_space<vmem>>, vector<2x401xf32>,
    %cst_4 = arith.constant 0.000000e+00 : f32
    %4 = vector.broadcast %cst_4 : f32 to vector<72x256xf32>
    %c0_5 = arith.constant 0 : index
    %c0_6 = arith.constant 0 : index
    %5 = vector.load %arg14[%c0_5, %c0_6] : memref<72x256xf32, #tpu.memory_space<vmem>>, vector<72x256xf32>
    tpu.vector_store %arg14[%c0_5, %c0_6], %4 {strides = array<i32>} : memref<72x256xf32, #tpu.memory_space<vmem>>, vector<72x256xf32>,
    %cst_7 = arith.constant 0.000000e+00 : f32
    %6 = vector.broadcast %cst_7 : f32 to vector<24x256xf32>
    %c0_8 = arith.constant 0 : index
    %c0_9 = arith.constant 0 : index
    %7 = vector.load %arg15[%c0_8, %c0_9] : memref<24x256xf32, #tpu.memory_space<vmem>>, vector<24x256xf32>
    tpu.vector_store %arg15[%c0_8, %c0_9], %6 {strides = array<i32>} : memref<24x256xf32, #tpu.memory_space<vmem>>, vector<24x256xf32>,
    %8 = tpu.iota {dimensions = array<i32: 1>} : vector<2x256xi32>
    %c16_i32 = arith.constant 16 : i32
    %c0_i32 = arith.constant 0 : i32
    %9 = arith.cmpi eq, %c16_i32, %c0_i32 : i32
    %c1_i32 = arith.constant 1 : i32
    %10 = arith.select %9, %c1_i32, %c16_i32 : i32
    %11 = vector.broadcast %10 : i32 to vector<2x256xi32>
    %12 = arith.remsi %8, %11 : vector<2x256xi32>
    %c0_i32_10 = arith.constant 0 : i32
    %13 = vector.broadcast %c0_i32_10 : i32 to vector<2x256xi32>
    %14 = arith.cmpi ne, %12, %13 : vector<2x256xi32>
    %c0_i32_11 = arith.constant 0 : i32
    %15 = vector.broadcast %c0_i32_11 : i32 to vector<2x256xi32>
    %16 = arith.cmpi slt, %12, %15 : vector<2x256xi32>
    %c0_i32_12 = arith.constant 0 : i32
    %17 = arith.cmpi slt, %10, %c0_i32_12 : i32
    %18 = vector.broadcast %17 : i1 to vector<2x256xi1>
    %19 = vector.broadcast %18 : vector<2x256xi1> to vector<2x256xi1>
    %20 = arith.xori %16, %19 : vector<2x256xi1>
    %21 = arith.andi %20, %14 : vector<2x256xi1>
    %22 = vector.broadcast %10 : i32 to vector<2x256xi32>
    %23 = arith.addi %12, %22 : vector<2x256xi32>
    %24 = arith.select %21, %23, %12 : vector<2x256xi1>, vector<2x256xi32>
    %c0_i32_13 = arith.constant 0 : i32
    %25 = vector.broadcast %c0_i32_13 : i32 to vector<2x256xi32>
    %26 = arith.cmpi ne, %24, %25 : vector<2x256xi32>
    %c15_i32 = arith.constant 15 : i32
    %27 = vector.broadcast %c15_i32 : i32 to vector<2x256xi32>
    %28 = arith.cmpi ne, %24, %27 : vector<2x256xi32>
    %c0_14 = arith.constant 0 : index
    %c0_15 = arith.constant 0 : index
    %29 = vector.load %arg2[%c0_14, %c0_15] : memref<2x4xf32, #tpu.memory_space<vmem>>, vector<2x4xf32>
    %cst_16 = arith.constant dense<0.000000e+00> : vector<2x256xf32>
    %30 = tpu.matmul %29, %1, %cst_16 {dimension_numbers = #tpu.dot_dimension_numbers<[1], [0], [0], [1], [0, 0, 1, 1], [], []>} : vector<2x4xf32>, vector<4x256xf32>, vector<2x256xf32> -> vector<2x256xf32>
    %c0_17 = arith.constant 0 : index
    %c0_18 = arith.constant 0 : index
    %31 = vector.load %arg3[%c0_17, %c0_18] : memref<2x1xf32, #tpu.memory_space<vmem>>, vector<2x1xf32>
    %32 = vector.broadcast %31 : vector<2x1xf32> to vector<2x256xf32>
    %33 = arith.addf %30, %32 : vector<2x256xf32>
    %34 = arith.negf %33 : vector<2x256xf32>
    %35 = math.exp %34 : vector<2x256xf32>
    %cst_19 = arith.constant 1.000000e+00 : f32
    %36 = vector.broadcast %cst_19 : f32 to vector<2x256xf32>
    %37 = arith.addf %36, %35 : vector<2x256xf32>
    %38 = arith.divf %36, %37 : vector<2x256xf32>
    %39 = arith.mulf %33, %38 : vector<2x256xf32>
    %c0_20 = arith.constant 0 : index
    %c0_21 = arith.constant 0 : index
    %40 = vector.load %arg4[%c0_20, %c0_21] : memref<2x4xf32, #tpu.memory_space<vmem>>, vector<2x4xf32>
    %cst_22 = arith.constant dense<0.000000e+00> : vector<2x256xf32>
    %41 = tpu.matmul %40, %1, %cst_22 {dimension_numbers = #tpu.dot_dimension_numbers<[1], [0], [0], [1], [0, 0, 1, 1], [], []>} : vector<2x4xf32>, vector<4x256xf32>, vector<2x256xf32> -> vector<2x256xf32>
    %c0_23 = arith.constant 0 : index
    %c0_24 = arith.constant 0 : index
    %42 = vector.load %arg5[%c0_23, %c0_24] : memref<2x1xf32, #tpu.memory_space<vmem>>, vector<2x1xf32>
    %43 = vector.broadcast %42 : vector<2x1xf32> to vector<2x256xf32>
    %44 = arith.addf %41, %43 : vector<2x256xf32>
    %45 = arith.negf %44 : vector<2x256xf32>
    %46 = math.exp %45 : vector<2x256xf32>
    %cst_25 = arith.constant 1.000000e+00 : f32
    %47 = vector.broadcast %cst_25 : f32 to vector<2x256xf32>
    %48 = arith.addf %47, %46 : vector<2x256xf32>
    %49 = arith.divf %47, %48 : vector<2x256xf32>
    %50 = arith.mulf %44, %49 : vector<2x256xf32>
    %c0_26 = arith.constant 0 : index
    %c0_27 = arith.constant 0 : index
    %51 = vector.load %arg15[%c0_26, %c0_27] : memref<24x256xf32, #tpu.memory_space<vmem>>, vector<2x256xf32>
    tpu.vector_store %arg15[%c0_26, %c0_27], %39 {strides = array<i32>} : memref<24x256xf32, #tpu.memory_space<vmem>>, vector<2x256xf32>,
    %c8 = arith.constant 8 : index
    %c0_28 = arith.constant 0 : index
    %52 = vector.load %arg15[%c8, %c0_28] : memref<24x256xf32, #tpu.memory_space<vmem>>, vector<2x256xf32>
    tpu.vector_store %arg15[%c8, %c0_28], %50 {strides = array<i32>} : memref<24x256xf32, #tpu.memory_space<vmem>>, vector<2x256xf32>,
    %c0_29 = arith.constant 0 : index
    %c128 = arith.constant 128 : index
    %53 = vector.load %arg13[%c0_29, %c128] : memref<2x401xf32, #tpu.memory_space<vmem>>, vector<2x256xf32>
    tpu.vector_store %arg13[%c0_29, %c128], %50 {strides = array<i32>} : memref<2x401xf32, #tpu.memory_space<vmem>>, vector<2x256xf32>,
    %c0_30 = arith.constant 0 : index
    %c111 = arith.constant 111 : index
    %54 = vector.load %arg13[%c0_30, %c111] : memref<2x401xf32, #tpu.memory_space<vmem>>, vector<2x256xf32>
    %cst_31 = arith.constant 0.000000e+00 : f32
    %55 = vector.broadcast %cst_31 : f32 to vector<2x256xf32>
    %56 = arith.select %26, %54, %55 : vector<2x256xi1>, vector<2x256xf32>
    %c0_32 = arith.constant 0 : index
    %c0_33 = arith.constant 0 : index
    %57 = vector.load %arg14[%c0_32, %c0_33] : memref<72x256xf32, #tpu.memory_space<vmem>>, vector<2x256xf32>
    tpu.vector_store %arg14[%c0_32, %c0_33], %56 {strides = array<i32>} : memref<72x256xf32, #tpu.memory_space<vmem>>, vector<2x256xf32>,
    %c0_34 = arith.constant 0 : index
    %c112 = arith.constant 112 : index
    %58 = vector.load %arg13[%c0_34, %c112] : memref<2x401xf32, #tpu.memory_space<vmem>>, vector<2x256xf32>
    %c8_35 = arith.constant 8 : index
    %c0_36 = arith.constant 0 : index
    %59 = vector.load %arg14[%c8_35, %c0_36] : memref<72x256xf32, #tpu.memory_space<vmem>>, vector<2x256xf32>
    tpu.vector_store %arg14[%c8_35, %c0_36], %58 {strides = array<i32>} : memref<72x256xf32, #tpu.memory_space<vmem>>, vector<2x256xf32>,
    %c0_37 = arith.constant 0 : index
    %c113 = arith.constant 113 : index
    %60 = vector.load %arg13[%c0_37, %c113] : memref<2x401xf32, #tpu.memory_space<vmem>>, vector<2x256xf32>
    %cst_38 = arith.constant 0.000000e+00 : f32
    %61 = vector.broadcast %cst_38 : f32 to vector<2x256xf32>
    %62 = arith.select %28, %60, %61 : vector<2x256xi1>, vector<2x256xf32>
    %c16 = arith.constant 16 : index
    %c0_39 = arith.constant 0 : index
    %63 = vector.load %arg14[%c16, %c0_39] : memref<72x256xf32, #tpu.memory_space<vmem>>, vector<2x256xf32>
    tpu.vector_store %arg14[%c16, %c0_39], %62 {strides = array<i32>} : memref<72x256xf32, #tpu.memory_space<vmem>>, vector<2x256xf32>,
    %c0_40 = arith.constant 0 : index
    %c127 = arith.constant 127 : index
    %64 = vector.load %arg13[%c0_40, %c127] : memref<2x401xf32, #tpu.memory_space<vmem>>, vector<2x256xf32>
    %cst_41 = arith.constant 0.000000e+00 : f32
    %65 = vector.broadcast %cst_41 : f32 to vector<2x256xf32>
    %66 = arith.select %26, %64, %65 : vector<2x256xi1>, vector<2x256xf32>
    %c24 = arith.constant 24 : index
    %c0_42 = arith.constant 0 : index
    %67 = vector.load %arg14[%c24, %c0_42] : memref<72x256xf32, #tpu.memory_space<vmem>>, vector<2x256xf32>
    tpu.vector_store %arg14[%c24, %c0_42], %66 {strides = array<i32>} : memref<72x256xf32, #tpu.memory_space<vmem>>, vector<2x256xf32>,
    %c0_43 = arith.constant 0 : index
    %c128_44 = arith.constant 128 : index
    %68 = vector.load %arg13[%c0_43, %c128_44] : memref<2x401xf32, #tpu.memory_space<vmem>>, vector<2x256xf32>
    %c32 = arith.constant 32 : index
    %c0_45 = arith.constant 0 : index
    %69 = vector.load %arg14[%c32, %c0_45] : memref<72x256xf32, #tpu.memory_space<vmem>>, vector<2x256xf32>
    tpu.vector_store %arg14[%c32, %c0_45], %68 {strides = array<i32>} : memref<72x256xf32, #tpu.memory_space<vmem>>, vector<2x256xf32>,
    %c0_46 = arith.constant 0 : index
    %c129 = arith.constant 129 : index
    %70 = vector.load %arg13[%c0_46, %c129] : memref<2x401xf32, #tpu.memory_space<vmem>>, vector<2x256xf32>
    %cst_47 = arith.constant 0.000000e+00 : f32
    %71 = vector.broadcast %cst_47 : f32 to vector<2x256xf32>
    %72 = arith.select %28, %70, %71 : vector<2x256xi1>, vector<2x256xf32>
    %c40 = arith.constant 40 : index
    %c0_48 = arith.constant 0 : index
    %73 = vector.load %arg14[%c40, %c0_48] : memref<72x256xf32, #tpu.memory_space<vmem>>, vector<2x256xf32>
    tpu.vector_store %arg14[%c40, %c0_48], %72 {strides = array<i32>} : memref<72x256xf32, #tpu.memory_space<vmem>>, vector<2x256xf32>,
    %c0_49 = arith.constant 0 : index
    %c143 = arith.constant 143 : index
    %74 = vector.load %arg13[%c0_49, %c143] : memref<2x401xf32, #tpu.memory_space<vmem>>, vector<2x256xf32>
    %cst_50 = arith.constant 0.000000e+00 : f32
    %75 = vector.broadcast %cst_50 : f32 to vector<2x256xf32>
    %76 = arith.select %26, %74, %75 : vector<2x256xi1>, vector<2x256xf32>
    %c48 = arith.constant 48 : index
    %c0_51 = arith.constant 0 : index
    %77 = vector.load %arg14[%c48, %c0_51] : memref<72x256xf32, #tpu.memory_space<vmem>>, vector<2x256xf32>
    tpu.vector_store %arg14[%c48, %c0_51], %76 {strides = array<i32>} : memref<72x256xf32, #tpu.memory_space<vmem>>, vector<2x256xf32>,
    %c0_52 = arith.constant 0 : index
    %c144 = arith.constant 144 : index
    %78 = vector.load %arg13[%c0_52, %c144] : memref<2x401xf32, #tpu.memory_space<vmem>>, vector<2x256xf32>
    %c56 = arith.constant 56 : index
    %c0_53 = arith.constant 0 : index
    %79 = vector.load %arg14[%c56, %c0_53] : memref<72x256xf32, #tpu.memory_space<vmem>>, vector<2x256xf32>
    tpu.vector_store %arg14[%c56, %c0_53], %78 {strides = array<i32>} : memref<72x256xf32, #tpu.memory_space<vmem>>, vector<2x256xf32>,
    %c0_54 = arith.constant 0 : index
    %c145 = arith.constant 145 : index
    %80 = vector.load %arg13[%c0_54, %c145] : memref<2x401xf32, #tpu.memory_space<vmem>>, vector<2x256xf32>
    %cst_55 = arith.constant 0.000000e+00 : f32
    %81 = vector.broadcast %cst_55 : f32 to vector<2x256xf32>
    %82 = arith.select %28, %80, %81 : vector<2x256xi1>, vector<2x256xf32>
    %c64 = arith.constant 64 : index
    %c0_56 = arith.constant 0 : index
    %83 = vector.load %arg14[%c64, %c0_56] : memref<72x256xf32, #tpu.memory_space<vmem>>, vector<2x256xf32>
    tpu.vector_store %arg14[%c64, %c0_56], %82 {strides = array<i32>} : memref<72x256xf32, #tpu.memory_space<vmem>>, vector<2x256xf32>,
    %c0_57 = arith.constant 0 : index
    %c0_58 = arith.constant 0 : index
    %84 = vector.load %arg6[%c0_57, %c0_58] : memref<2x72xf32, #tpu.memory_space<vmem>>, vector<2x72xf32>
    %c0_59 = arith.constant 0 : index
    %c0_60 = arith.constant 0 : index
    %85 = vector.load %arg14[%c0_59, %c0_60] : memref<72x256xf32, #tpu.memory_space<vmem>>, vector<72x256xf32>
    %cst_61 = arith.constant dense<0.000000e+00> : vector<2x256xf32>
    %86 = tpu.matmul %84, %85, %cst_61 {dimension_numbers = #tpu.dot_dimension_numbers<[1], [0], [0], [1], [0, 0, 1, 1], [], []>} : vector<2x72xf32>, vector<72x256xf32>, vector<2x256xf32> -> vector<2x256xf32>
    %c0_62 = arith.constant 0 : index
    %c0_63 = arith.constant 0 : index
    %87 = vector.load %arg7[%c0_62, %c0_63] : memref<2x1xf32, #tpu.memory_space<vmem>>, vector<2x1xf32>
    %88 = vector.broadcast %87 : vector<2x1xf32> to vector<2x256xf32>
    %89 = arith.addf %86, %88 : vector<2x256xf32>
    %90 = arith.negf %89 : vector<2x256xf32>
    %91 = math.exp %90 : vector<2x256xf32>
    %cst_64 = arith.constant 1.000000e+00 : f32
    %92 = vector.broadcast %cst_64 : f32 to vector<2x256xf32>
    %93 = arith.addf %92, %91 : vector<2x256xf32>
    %94 = arith.divf %92, %93 : vector<2x256xf32>
    %95 = arith.mulf %89, %94 : vector<2x256xf32>
    %c0_65 = arith.constant 0 : index
    %c128_66 = arith.constant 128 : index
    %96 = vector.load %arg13[%c0_65, %c128_66] : memref<2x401xf32, #tpu.memory_space<vmem>>, vector<2x256xf32>
    tpu.vector_store %arg13[%c0_65, %c128_66], %95 {strides = array<i32>} : memref<2x401xf32, #tpu.memory_space<vmem>>, vector<2x256xf32>,
    %c0_67 = arith.constant 0 : index
    %c111_68 = arith.constant 111 : index
    %97 = vector.load %arg13[%c0_67, %c111_68] : memref<2x401xf32, #tpu.memory_space<vmem>>, vector<2x256xf32>
    %cst_69 = arith.constant 0.000000e+00 : f32
    %98 = vector.broadcast %cst_69 : f32 to vector<2x256xf32>
    %99 = arith.select %26, %97, %98 : vector<2x256xi1>, vector<2x256xf32>
    %c0_70 = arith.constant 0 : index
    %c0_71 = arith.constant 0 : index
    %100 = vector.load %arg14[%c0_70, %c0_71] : memref<72x256xf32, #tpu.memory_space<vmem>>, vector<2x256xf32>
    tpu.vector_store %arg14[%c0_70, %c0_71], %99 {strides = array<i32>} : memref<72x256xf32, #tpu.memory_space<vmem>>, vector<2x256xf32>,
    %c0_72 = arith.constant 0 : index
    %c112_73 = arith.constant 112 : index
    %101 = vector.load %arg13[%c0_72, %c112_73] : memref<2x401xf32, #tpu.memory_space<vmem>>, vector<2x256xf32>
    %c8_74 = arith.constant 8 : index
    %c0_75 = arith.constant 0 : index
    %102 = vector.load %arg14[%c8_74, %c0_75] : memref<72x256xf32, #tpu.memory_space<vmem>>, vector<2x256xf32>
    tpu.vector_store %arg14[%c8_74, %c0_75], %101 {strides = array<i32>} : memref<72x256xf32, #tpu.memory_space<vmem>>, vector<2x256xf32>,
    %c0_76 = arith.constant 0 : index
    %c113_77 = arith.constant 113 : index
    %103 = vector.load %arg13[%c0_76, %c113_77] : memref<2x401xf32, #tpu.memory_space<vmem>>, vector<2x256xf32>
    %cst_78 = arith.constant 0.000000e+00 : f32
    %104 = vector.broadcast %cst_78 : f32 to vector<2x256xf32>
    %105 = arith.select %28, %103, %104 : vector<2x256xi1>, vector<2x256xf32>
    %c16_79 = arith.constant 16 : index
    %c0_80 = arith.constant 0 : index
    %106 = vector.load %arg14[%c16_79, %c0_80] : memref<72x256xf32, #tpu.memory_space<vmem>>, vector<2x256xf32>
    tpu.vector_store %arg14[%c16_79, %c0_80], %105 {strides = array<i32>} : memref<72x256xf32, #tpu.memory_space<vmem>>, vector<2x256xf32>,
    %c0_81 = arith.constant 0 : index
    %c127_82 = arith.constant 127 : index
    %107 = vector.load %arg13[%c0_81, %c127_82] : memref<2x401xf32, #tpu.memory_space<vmem>>, vector<2x256xf32>
    %cst_83 = arith.constant 0.000000e+00 : f32
    %108 = vector.broadcast %cst_83 : f32 to vector<2x256xf32>
    %109 = arith.select %26, %107, %108 : vector<2x256xi1>, vector<2x256xf32>
    %c24_84 = arith.constant 24 : index
    %c0_85 = arith.constant 0 : index
    %110 = vector.load %arg14[%c24_84, %c0_85] : memref<72x256xf32, #tpu.memory_space<vmem>>, vector<2x256xf32>
    tpu.vector_store %arg14[%c24_84, %c0_85], %109 {strides = array<i32>} : memref<72x256xf32, #tpu.memory_space<vmem>>, vector<2x256xf32>,
    %c0_86 = arith.constant 0 : index
    %c128_87 = arith.constant 128 : index
    %111 = vector.load %arg13[%c0_86, %c128_87] : memref<2x401xf32, #tpu.memory_space<vmem>>, vector<2x256xf32>
    %c32_88 = arith.constant 32 : index
    %c0_89 = arith.constant 0 : index
    %112 = vector.load %arg14[%c32_88, %c0_89] : memref<72x256xf32, #tpu.memory_space<vmem>>, vector<2x256xf32>
    tpu.vector_store %arg14[%c32_88, %c0_89], %111 {strides = array<i32>} : memref<72x256xf32, #tpu.memory_space<vmem>>, vector<2x256xf32>,
    %c0_90 = arith.constant 0 : index
    %c129_91 = arith.constant 129 : index
    %113 = vector.load %arg13[%c0_90, %c129_91] : memref<2x401xf32, #tpu.memory_space<vmem>>, vector<2x256xf32>
    %cst_92 = arith.constant 0.000000e+00 : f32
    %114 = vector.broadcast %cst_92 : f32 to vector<2x256xf32>
    %115 = arith.select %28, %113, %114 : vector<2x256xi1>, vector<2x256xf32>
    %c40_93 = arith.constant 40 : index
    %c0_94 = arith.constant 0 : index
    %116 = vector.load %arg14[%c40_93, %c0_94] : memref<72x256xf32, #tpu.memory_space<vmem>>, vector<2x256xf32>
    tpu.vector_store %arg14[%c40_93, %c0_94], %115 {strides = array<i32>} : memref<72x256xf32, #tpu.memory_space<vmem>>, vector<2x256xf32>,
    %c0_95 = arith.constant 0 : index
    %c143_96 = arith.constant 143 : index
    %117 = vector.load %arg13[%c0_95, %c143_96] : memref<2x401xf32, #tpu.memory_space<vmem>>, vector<2x256xf32>
    %cst_97 = arith.constant 0.000000e+00 : f32
    %118 = vector.broadcast %cst_97 : f32 to vector<2x256xf32>
    %119 = arith.select %26, %117, %118 : vector<2x256xi1>, vector<2x256xf32>
    %c48_98 = arith.constant 48 : index
    %c0_99 = arith.constant 0 : index
    %120 = vector.load %arg14[%c48_98, %c0_99] : memref<72x256xf32, #tpu.memory_space<vmem>>, vector<2x256xf32>
    tpu.vector_store %arg14[%c48_98, %c0_99], %119 {strides = array<i32>} : memref<72x256xf32, #tpu.memory_space<vmem>>, vector<2x256xf32>,
    %c0_100 = arith.constant 0 : index
    %c144_101 = arith.constant 144 : index
    %121 = vector.load %arg13[%c0_100, %c144_101] : memref<2x401xf32, #tpu.memory_space<vmem>>, vector<2x256xf32>
    %c56_102 = arith.constant 56 : index
    %c0_103 = arith.constant 0 : index
    %122 = vector.load %arg14[%c56_102, %c0_103] : memref<72x256xf32, #tpu.memory_space<vmem>>, vector<2x256xf32>
    tpu.vector_store %arg14[%c56_102, %c0_103], %121 {strides = array<i32>} : memref<72x256xf32, #tpu.memory_space<vmem>>, vector<2x256xf32>,
    %c0_104 = arith.constant 0 : index
    %c145_105 = arith.constant 145 : index
    %123 = vector.load %arg13[%c0_104, %c145_105] : memref<2x401xf32, #tpu.memory_space<vmem>>, vector<2x256xf32>
    %cst_106 = arith.constant 0.000000e+00 : f32
    %124 = vector.broadcast %cst_106 : f32 to vector<2x256xf32>
    %125 = arith.select %28, %123, %124 : vector<2x256xi1>, vector<2x256xf32>
    %c64_107 = arith.constant 64 : index
    %c0_108 = arith.constant 0 : index
    %126 = vector.load %arg14[%c64_107, %c0_108] : memref<72x256xf32, #tpu.memory_space<vmem>>, vector<2x256xf32>
    tpu.vector_store %arg14[%c64_107, %c0_108], %125 {strides = array<i32>} : memref<72x256xf32, #tpu.memory_space<vmem>>, vector<2x256xf32>,
    %c0_109 = arith.constant 0 : index
    %c0_110 = arith.constant 0 : index
    %127 = vector.load %arg8[%c0_109, %c0_110] : memref<2x72xf32, #tpu.memory_space<vmem>>, vector<2x72xf32>
    %c0_111 = arith.constant 0 : index
    %c0_112 = arith.constant 0 : index
    %128 = vector.load %arg14[%c0_111, %c0_112] : memref<72x256xf32, #tpu.memory_space<vmem>>, vector<72x256xf32>
    %cst_113 = arith.constant dense<0.000000e+00> : vector<2x256xf32>
    %129 = tpu.matmul %127, %128, %cst_113 {dimension_numbers = #tpu.dot_dimension_numbers<[1], [0], [0], [1], [0, 0, 1, 1], [], []>} : vector<2x72xf32>, vector<72x256xf32>, vector<2x256xf32> -> vector<2x256xf32>
    %c0_114 = arith.constant 0 : index
    %c0_115 = arith.constant 0 : index
    %130 = vector.load %arg9[%c0_114, %c0_115] : memref<2x1xf32, #tpu.memory_space<vmem>>, vector<2x1xf32>
    %131 = vector.broadcast %130 : vector<2x1xf32> to vector<2x256xf32>
    %132 = arith.addf %129, %131 : vector<2x256xf32>
    %133 = arith.negf %132 : vector<2x256xf32>
    %134 = math.exp %133 : vector<2x256xf32>
    %cst_116 = arith.constant 1.000000e+00 : f32
    %135 = vector.broadcast %cst_116 : f32 to vector<2x256xf32>
    %136 = arith.addf %135, %134 : vector<2x256xf32>
    %137 = arith.divf %135, %136 : vector<2x256xf32>
    %138 = arith.mulf %132, %137 : vector<2x256xf32>
    %139 = arith.addf %50, %138 : vector<2x256xf32>
    %c16_117 = arith.constant 16 : index
    %c0_118 = arith.constant 0 : index
    %140 = vector.load %arg15[%c16_117, %c0_118] : memref<24x256xf32, #tpu.memory_space<vmem>>, vector<2x256xf32>
    tpu.vector_store %arg15[%c16_117, %c0_118], %139 {strides = array<i32>} : memref<24x256xf32, #tpu.memory_space<vmem>>, vector<2x256xf32>,
    %c0_119 = arith.constant 0 : index
    %c0_120 = arith.constant 0 : index
    %141 = vector.load %arg10[%c0_119, %c0_120] : memref<4x24xf32, #tpu.memory_space<vmem>>, vector<4x24xf32>
    %c0_121 = arith.constant 0 : index
    %c0_122 = arith.constant 0 : index
    %142 = vector.load %arg15[%c0_121, %c0_122] : memref<24x256xf32, #tpu.memory_space<vmem>>, vector<24x256xf32>
    %cst_123 = arith.constant dense<0.000000e+00> : vector<4x256xf32>
    %143 = tpu.matmul %141, %142, %cst_123 {dimension_numbers = #tpu.dot_dimension_numbers<[1], [0], [0], [1], [0, 0, 1, 1], [], []>} : vector<4x24xf32>, vector<24x256xf32>, vector<4x256xf32> -> vector<4x256xf32>
    %c0_124 = arith.constant 0 : index
    %c0_125 = arith.constant 0 : index
    %144 = vector.load %arg11[%c0_124, %c0_125] : memref<4x1xf32, #tpu.memory_space<vmem>>, vector<4x1xf32>
    %145 = vector.broadcast %144 : vector<4x1xf32> to vector<4x256xf32>
    %146 = arith.addf %143, %145 : vector<4x256xf32>
    %147 = arith.negf %146 : vector<4x256xf32>
    %148 = math.exp %147 : vector<4x256xf32>
    %cst_126 = arith.constant 1.000000e+00 : f32
    %149 = vector.broadcast %cst_126 : f32 to vector<4x256xf32>
    %150 = arith.addf %149, %148 : vector<4x256xf32>
    %151 = arith.divf %149, %150 : vector<4x256xf32>
    %152 = arith.mulf %146, %151 : vector<4x256xf32>
    %c0_127 = arith.constant 0 : index
    %c0_128 = arith.constant 0 : index
    %c0_129 = arith.constant 0 : index
    %153 = vector.load %arg12[%c0_127, %c0_128, %c0_129] : memref<1x4x256xf32, #tpu.memory_space<vmem>>, vector<1x4x256xf32>
    %154 = vector.shape_cast %153 : vector<1x4x256xf32> to vector<4x256xf32>
    %155 = vector.shape_cast %152 : vector<4x256xf32> to vector<1x4x256xf32>
    tpu.vector_store %arg12[%c0_127, %c0_128, %c0_129], %155 {strides = array<i32>} : memref<1x4x256xf32, #tpu.memory_space<vmem>>, vector<1x4x256xf32>,
    return
  }
  func.func @transform_0(%arg0: i32) -> (i32, i32, i32) {
    %c0_i32 = arith.constant 0 : i32
    %c0_i32_0 = arith.constant 0 : i32
    %c0_i32_1 = arith.constant 0 : i32
    return %arg0, %c0_i32, %c0_i32_0 : i32, i32, i32
  }
  func.func @transform_1(%arg0: i32) -> (i32, i32) {
    %c0_i32 = arith.constant 0 : i32
    %c0_i32_0 = arith.constant 0 : i32
    %c0_i32_1 = arith.constant 0 : i32
    return %c0_i32, %c0_i32_0 : i32, i32
  }
  func.func @transform_2(%arg0: i32) -> (i32, i32) {
    %c0_i32 = arith.constant 0 : i32
    %c0_i32_0 = arith.constant 0 : i32
    %c0_i32_1 = arith.constant 0 : i32
    return %c0_i32, %c0_i32_0 : i32, i32
  }
  func.func @transform_3(%arg0: i32) -> (i32, i32) {
    %c0_i32 = arith.constant 0 : i32
    %c0_i32_0 = arith.constant 0 : i32
    %c0_i32_1 = arith.constant 0 : i32
    return %c0_i32, %c0_i32_0 : i32, i32
  }
  func.func @transform_4(%arg0: i32) -> (i32, i32) {
    %c0_i32 = arith.constant 0 : i32
    %c0_i32_0 = arith.constant 0 : i32
    %c0_i32_1 = arith.constant 0 : i32
    return %c0_i32, %c0_i32_0 : i32, i32
  }
  func.func @transform_5(%arg0: i32) -> (i32, i32) {
    %c0_i32 = arith.constant 0 : i32
    %c0_i32_0 = arith.constant 0 : i32
    %c0_i32_1 = arith.constant 0 : i32
    return %c0_i32, %c0_i32_0 : i32, i32
  }
  func.func @transform_6(%arg0: i32) -> (i32, i32) {
    %c0_i32 = arith.constant 0 : i32
    %c0_i32_0 = arith.constant 0 : i32
    %c0_i32_1 = arith.constant 0 : i32
    return %c0_i32, %c0_i32_0 : i32, i32
  }
  func.func @transform_7(%arg0: i32) -> (i32, i32) {
    %c0_i32 = arith.constant 0 : i32
    %c0_i32_0 = arith.constant 0 : i32
    %c0_i32_1 = arith.constant 0 : i32
    return %c0_i32, %c0_i32_0 : i32, i32
  }
  func.func @transform_8(%arg0: i32) -> (i32, i32) {
    %c0_i32 = arith.constant 0 : i32
    %c0_i32_0 = arith.constant 0 : i32
    %c0_i32_1 = arith.constant 0 : i32
    return %c0_i32, %c0_i32_0 : i32, i32
  }
  func.func @transform_9(%arg0: i32) -> (i32, i32) {
    %c0_i32 = arith.constant 0 : i32
    %c0_i32_0 = arith.constant 0 : i32
    %c0_i32_1 = arith.constant 0 : i32
    return %c0_i32, %c0_i32_0 : i32, i32
  }
  func.func @transform_10(%arg0: i32) -> (i32, i32) {
    %c0_i32 = arith.constant 0 : i32
    %c0_i32_0 = arith.constant 0 : i32
    %c0_i32_1 = arith.constant 0 : i32
    return %c0_i32, %c0_i32_0 : i32, i32
  }
  func.func @transform_11(%arg0: i32) -> (i32, i32, i32) {
    %c0_i32 = arith.constant 0 : i32
    %c0_i32_0 = arith.constant 0 : i32
    %c0_i32_1 = arith.constant 0 : i32
    return %arg0, %c0_i32, %c0_i32_0 : i32, i32, i32
  }
}

</mosaic_0001>

<bundles_post_ra>
// kernel: _lambda_.1
= control target key start
LH: loop header
LB: loop body
LE: loop exit
PB: predicated region body
PF: predicated region fallthrough
CT: control target
= control target key end

     0   :  { %s1839_s17 = smov 0   ;;  %s2131_s0 = inlined_call_operand.vmem [shape: f32[2,4,256], index: 0, kind: input, shape index: {}]   ;;  %s2132_s1 = inlined_call_operand.vmem [shape: f32[2,4], index: 1, kind: input, shape index: {}]   ;;  %s2133_s2 = inlined_call_operand.vmem [shape: f32[2,1], index: 2, kind: input, shape index: {}]   ;;  %s2134_s3 = inlined_call_operand.vmem [shape: f32[2,4], index: 3, kind: input, shape index: {}]   ;;  %s2135_s4 = inlined_call_operand.vmem [shape: f32[2,1], index: 4, kind: input, shape index: {}]   ;;  %s2136_s5 = inlined_call_operand.vmem [shape: f32[2,72], index: 5, kind: input, shape index: {}]   ;;  %s2137_s6 = inlined_call_operand.vmem [shape: f32[2,1], index: 6, kind: input, shape index: {}]   ;;  %s2138_s7 = inlined_call_operand.vmem [shape: f32[2,72], index: 7, kind: input, shape index: {}]   ;;  %s2139_s8 = inlined_call_operand.vmem [shape: f32[2,1], index: 8, kind: input, shape index: {}]   ;;  %s2140_s9 = inlined_call_operand.vmem [shape: f32[4,24], index: 9, kind: input, shape index: {}]   ;;  %s2141_s10 = inlined_call_operand.vmem [shape: f32[4,1], index: 10, kind: input, shape index: {}]   ;;  %s2142_s11 = inlined_call_operand.vmem [shape: f32[2,4,256], index: 11, kind: output, shape index: {}]  }
   0x1 LB: > { %s1610_s18 = sadd.s32 4294967295, %s1766_s17   ;;  %p1614_p0 = scmp.ge.s32.totalorder %s1766_s17, 1  ;;  %s1766_s17 = sphi %s1839_s17, %s21_s17  }
   0x2   : > { %p337_p1 = scmp.lt.s32.totalorder %s1766_s17, 3 }
   0x4   : > { %p338_p2 = pnand %p1614_p0, %p337_p1 }
   0x5   : > { %p1849_p3 = scmp.lt.s32.totalorder (!%p338_p2), %s1610_s18, 1  ;;  %v1768_v0 = vmov (!%p338_p2), 0.0   ;;  %v555_v1 = vld [vmem:[%s2135_s4] sm:$0x3] (!%p338_p2)  ;;  %v1769_v2 = vmov (!%p338_p2), 0   ;;  %vm464_vm0 = vcmask (!%p338_p2), 1043456   ;;  %v420_v24 = vlaneseq (!%p338_p2) }
   0x6   : > { %341 = sbr.rel (%p338_p2) target bundleno = 1381 (0x565), region = 64  ;;  %533 = vmatprep.mubr.f32.mxu1 (!%p338_p2), %v1768_v0  ;;  %396 = vst [vmem:[#allocation3] sm:$0xff] (!%p338_p2), %v1768_v0  ;;  %397 = vst [vmem:[#allocation3 + $0x8] sm:$0xff] (!%p338_p2), %v1768_v0  ;;  %1032 = vmatprep.mubr.f32.mxu0 (!%p338_p2), %v1768_v0  ;;  %v451_v5 = vld [vmem:[%s2132_s1] sm:$0x3] (!%p338_p2)  ;;  %vm460_vm1 = vcmask (!%p338_p2), 31744  }
   0x7   : > { %398 = vst [vmem:[#allocation3 + $0x10] sm:$0xff] (!%p338_p2), %v1768_v0  ;;  %399 = vst [vmem:[#allocation3 + $0x18] sm:$0xff] (!%p338_p2), %v1768_v0  ;;  %1701 = vset.pattern.permute.xlu0 (!%p338_p2), %v1769_v2  ;;  %1702 = vset.pattern.permute.xlu1 (!%p338_p2), %v1769_v2  ;;  %v554_v6 = vld [vmem:[%s2134_s3] sm:$0x3] (!%p338_p2)  ;;  %vm388_vm2 = vcmask (!%p338_p2), 1041408   ;;  %vm389_vm3 = vcmask (!%p338_p2), 1043458  }
   0x8   : > { %400 = vst [vmem:[#allocation3 + $0x20] sm:$0xff] (!%p338_p2), %v1768_v0  ;;  %401 = vst [vmem:[#allocation3 + $0x28] sm:$0xff] (!%p338_p2), %v1768_v0  ;;  %558 = vperm.xlu0 (!%p338_p2), %1701, %v555_v1   ;;  %vm391_vm5 = vcmask (!%p338_p2), 1045508   ;;  %vm393_vm7 = vcmask (!%p338_p2), 138246   ;;  %v1770_v25 = vmov (!%p338_p2), 1983009808  }
   0x9   : > { %402 = vst [vmem:[#allocation3 + $0x30] sm:$0xff] (!%p338_p2), %v1768_v0  ;;  %403 = vst [vmem:[#allocation3 + $0x38] sm:$0xff] (!%p338_p2), %v1768_v0  ;;  %v669_v26 = vunpack.c.l.s4 (!%p338_p2), %v1770_v25  ;;  %v672_v29 = vshrl.u32 (!%p338_p2), %v420_v24, 7  ;;  %s1771_s30 = smov (!%p338_p2), 16   ;;  %s1772_s12 = smov (!%p338_p2), 17   ;;  %vm689_vm9 = vcmask (!%p338_p2), 138240  }
   0xa   : > { %404 = vst [vmem:[#allocation3 + $0x40] sm:$0xff] (!%p338_p2), %v1768_v0  ;;  %405 = vst [vmem:[#allocation3 + $0x48] sm:$0xff] (!%p338_p2), %v1768_v0  ;;  %s1773_s13 = smov (!%p338_p2), 1   ;;  %s1774_s14 = smov (!%p338_p2), 15   ;;  %vm722_vm12 = vcmask (!%p338_p2), 130048   ;;  %vm753_vm13 = vcmask (!%p338_p2), 121856  }
   0xb   : > { %406 = vst [vmem:[#allocation3 + $0x50] sm:$0xff] (!%p338_p2), %v1768_v0  ;;  %407 = vst [vmem:[#allocation3 + $0x58] sm:$0xff] (!%p338_p2), %v1768_v0  ;;  %v670_v28 = vunpack.c.0.s8 (!%p338_p2), %v669_v26  ;;  %s1775_s15 = smov (!%p338_p2), 113   ;;  %s1776_s16 = smov (!%p338_p2), 127  }
   0xc   : > { %408 = vst [vmem:[#allocation3 + $0x60] sm:$0xff] (!%p338_p2), %v1768_v0  ;;  %409 = vst [vmem:[#allocation3 + $0x68] sm:$0xff] (!%p338_p2), %v1768_v0  ;;  %s1777_s19 = smov (!%p338_p2), 112   ;;  %s1778_s20 = smov (!%p338_p2), 111  }
   0xd   : > { %410 = vst [vmem:[#allocation3 + $0x70] sm:$0xff] %v1768_v0  ;;  %411 = vst [vmem:[#allocation3 + $0x78] sm:$0xff] %v1768_v0  ;;  %s2153_s18 = smov (!%p1849_p3, %s1610_s18), 1  ;;  %v1916_v30 = vsub.s32 %v670_v28, %v672_v29 }
   0xe   : > { %412 = vst [vmem:[#allocation3 + $0x80] sm:$0xff] %v1768_v0  ;;  %413 = vst [vmem:[#allocation3 + $0x88] sm:$0xff] %v1768_v0  ;;  %s1644_s22 = sshll.u32 %s2153_s18, 3 }
   0xf   : > { %414 = vst [vmem:[#allocation4] sm:$0xff] %v1768_v0  ;;  %415 = vst [vmem:[#allocation4 + $0x8] sm:$0xff] %v1768_v0  ;;  %s381_s25 = scalar_lea.vmem %s2131_s0, %s1644_s22  ;;  %s386_s21 = scalar_lea.vmem %s2142_s11, %s1644_s22 }
  0x10   : > { %416 = vst [vmem:[#allocation4 + $0x10] sm:$0xff] %v1768_v0  ;;  %417 = vst [vmem:[#allocation4 + $0x18] sm:$0xff] %v1768_v0  ;;  %v387_v3 = vld [vmem:[%s381_s25] sm:$0xff] }
  0x11   : > { %418 = vst [vmem:[#allocation4 + $0x20] sm:$0xff] %v1768_v0  ;;  %419 = vst [vmem:[#allocation4 + $0x28] sm:$0xff] %v1768_v0  ;;  %v459_v4 = vcombine.high %v387_v3, %v387_v3 }
  0x12   : > { %vm390_vm4 = vmor %vm389_vm3, %vm388_vm2  ;;  %vm866_vm2 = vcmask 924672   ;;  %vm899_vm3 = vcmask 916480  }
  0x13   : > { %1619 = vmatprep.subr.msk.mxu1 %vm464_vm0, %v459_v4  ;;  %vm392_vm6 = vmor %vm391_vm5, %vm390_vm4  ;;  %vm930_vm4 = vcmask 908288   ;;  %vm964_vm5 = vcmask 588800  }
  0x14   : > { %1620 = vmatpush1.msk.msra.mxu1 %vm464_vm0, %v387_v3  ;;  %vm394_vm8 = vmor %vm393_vm7, %vm392_vm6  ;;  %vm1461_vm6 = vcmask 195584  }
  0x15   : > { %1621 = vmatmul.mubr.msk.f32.vlgmr.msra.gmra.mrb[0].mxu1 %vm460_vm1, %v451_v5  ;;  %1624 = vmatprep.subr.msk.mxu1 %vm464_vm0, %v459_v4  ;;  %395 = vst.msk [vmem:[#allocation2] sm:$0xff] %vm394_vm8, %v1768_v0 }
  0x16   : > { %1625 = vmatpush1.msk.msra.mxu1 %vm464_vm0, %v387_v3  ;;  %628 = vmatprep.mubr.f32.mxu1 %v1768_v0  ;;  %vm786_vm0 = vcmask 7168  }
  0x19   : > { %1626 = vmatmul.mubr.msk.f32.vlgmr.msra.gmra.mrb[2].mxu1 %vm460_vm1, %v554_v6  ;;  %vm833_vm1 = vcmask 1039360  }
  0x1a   : > { %1423 = vmatprep.mubr.f32.mxu1 %v1768_v0 }
  0x87   : > { %v559_v9 = vpop.permute.xlu0 %558 }
  0xe8   : > { %v1903_v7 = vpop.f32.mrb[0].mxu1 }
  0xe9   : > { %v1905_v8 = vpop.f32.mrb[1].mxu1 }
  0xec   : > { %v630_v10 = vpop.f32.mrb[2].mxu1 }
  0xed   : > { %v631_v11 = vadd.f32 %v630_v10, %v559_v9  ;;  %v632_v12 = vpop.f32.mrb[3].mxu1 }
  0xee   : > { %v633_v13 = vadd.f32 %v632_v12, %v559_v9  ;;  %v958_v12 = vld [vmem:[%s2137_s6] sm:$0x3] }
  0xef   : > { %v1627_v14 = vmul.f32 -1.442695, %v631_v11 }
  0xf0   : > { %v1628_v15 = vmul.f32 -1.442695, %v633_v13 }
  0xf1   : > { %1720 = vpow2.f32 %v1627_v14  ;;  %v421_v14 = vand.u32 127, %v420_v24 }
  0xf2   : > { %1722 = vpow2.f32 %v1628_v15 }
  0xfb   : > { %v1721_v16 = vpop.eup %1720 }
  0xfc   : > { %v1723_v17 = vpop.eup %1722  ;;  %v641_v18 = vadd.f32 1.0, %v1721_v16 }
  0xfd   : > { %v642_v19 = vadd.f32 1.0, %v1723_v17  ;;  %v422_v17 = vadd.s32 128, %v421_v14 }
  0xfe   : > { %1724 = vrcp.f32 %v641_v18 }
  0xff   : > { %1726 = vrcp.f32 %v642_v19  ;;  %v427_v19 = vand.u32 15, %v421_v14 }
 0x101   : > { %vm1962_vm10 = vcmp.ne.s32.totalorder %v427_v19, 0  ;;  %vm1978_vm14 = vcmp.ne.s32.totalorder %v427_v19, 15 }
 0x108   : > { %v1725_v20 = vpop.eup %1724 }
 0x109   : > { %v1727_v21 = vpop.eup %1726  ;;  %v1907_v22 = vmul.f32 %v1725_v20, %v631_v11 }
 0x10a   : > { %v1909_v23 = vmul.f32 %v1727_v21, %v633_v13  ;;  %v434_v21 = vand.u32 15, %v422_v17 }
 0x10b   : > { %651 = vst [vmem:[#allocation4 + $0x10] sm:$0x3] %v1907_v22 }
 0x10c   : > { %652 = vst [vmem:[#allocation4 + $0x18] sm:$0x3] %v1909_v23  ;;  %v655_v27 = vcombine.low %v1907_v22, %v1909_v23  ;;  %vm1966_vm11 = vcmp.ne.s32.totalorder %v434_v21, 0  ;;  %vm1982_vm15 = vcmp.ne.s32.totalorder %v434_v21, 15 }
 0x10e   : > { %1629 = vst.sshfl [vmem:[#allocation2 + $0x2] sm:$0x33 pattern:$0x76325410] %v655_v27 }
 0x115   : > { %v1630_v31 = vld.sshfl [vmem:[#allocation2 + $0x2] sm:$0x33 pattern:$0x76325410] }
 0x116   : > { %v698_v32 = vld [vmem:[#allocation2] sm:$0x3f]  ;;  %807 = vst [vmem:[#allocation3 + $0x40] sm:$0x3] %v1630_v31  ;;  %v804_v35 = vcombine.high %v1630_v31, %v1630_v31 }
 0x117   : > { %v707_v33 = vrot.slane %v698_v32, %v1916_v30  ;;  %v665_v34 = vld [vmem:[#allocation2] sm:$0x3f]  ;;  %v700_v48 = vcombine.high %v698_v32, %v698_v32 }
 0x118   : > { %v674_v36 = vrot.slane %v665_v34, %v1916_v30  ;;  %v762_v37 = vld [vmem:[#allocation2] sm:$0x3f]  ;;  %808 = vst [vmem:[#allocation3 + $0x48] sm:$0x3] %v804_v35  ;;  %v667_v45 = vcombine.high %v665_v34, %v665_v34 }
 0x119   : > { %716 = vrot.lane.b32.xlu0 %v707_v33, %s1771_s30  ;;  %v729_v38 = vld [vmem:[#allocation2] sm:$0x3f]  ;;  %v771_v39 = vrot.slane %v762_v37, %v1916_v30  ;;  %v715_v49 = vcombine.high %v707_v33, %v707_v33  ;;  %v714_v51 = vrot.slane %v700_v48, %v1916_v30  ;;  %v764_v53 = vcombine.high %v762_v37, %v762_v37 }
 0x11a   : > { %683 = vrot.lane.b32.xlu1 %v674_v36, %s1772_s12  ;;  %v738_v40 = vrot.slane %v729_v38, %v1916_v30  ;;  %v842_v41 = vld [vmem:[#allocation2 + $0x2] sm:$0x3f]  ;;  %v682_v46 = vcombine.high %v674_v36, %v674_v36  ;;  %v681_v47 = vrot.slane %v667_v45, %v1916_v30  ;;  %v731_v50 = vcombine.high %v729_v38, %v729_v38 }
 0x11b   : > { %v809_v42 = vld [vmem:[#allocation2 + $0x2] sm:$0x3f]  ;;  %v851_v43 = vrot.slane %v842_v41, %v1916_v30  ;;  %v778_v55 = vrot.slane %v764_v53, %v1916_v30  ;;  %v779_v57 = vcombine.high %v771_v39, %v771_v39  ;;  %v844_v60 = vcombine.high %v842_v41, %v842_v41 }
 0x11c   : > { %v818_v44 = vrot.slane %v809_v42, %v1916_v30  ;;  %v745_v52 = vrot.slane %v731_v50, %v1916_v30  ;;  %v746_v54 = vcombine.high %v738_v40, %v738_v40  ;;  %v811_v56 = vcombine.high %v809_v42, %v809_v42  ;;  %v875_v61 = vld [vmem:[#allocation2 + $0x2] sm:$0x3f] }
 0x11d   : > { %780 = vrot.lane.b32.xlu0 %v771_v39, %s1773_s13  ;;  %v859_v62 = vcombine.high %v851_v43, %v851_v43  ;;  %v877_v63 = vcombine.high %v875_v61, %v875_v61  ;;  %v858_v1 = vrot.slane %v844_v60, %v1916_v30  ;;  %v884_v2 = vrot.slane %v875_v61, %v1916_v30  ;;  %v906_v3 = vld [vmem:[#allocation2 + $0x2] sm:$0x3f] }
 0x11e   : > { %747 = vrot.lane.b32.xlu1 %v738_v40, %s1774_s14  ;;  %v825_v58 = vrot.slane %v811_v56, %v1916_v30  ;;  %v826_v59 = vcombine.high %v818_v44, %v818_v44  ;;  %v915_v5 = vrot.slane %v906_v3, %v1916_v30  ;;  %v908_v10 = vcombine.high %v906_v3, %v906_v3 }
 0x11f   : > { %v891_v4 = vrot.slane %v877_v63, %v1916_v30  ;;  %v892_v6 = vcombine.high %v884_v2, %v884_v2  ;;  %v949_v19 = vld [vmem:[#allocation3 + $0x48] sm:$0xff] }
 0x120   : > { %v923_v9 = vcombine.high %v915_v5, %v915_v5  ;;  %v922_v11 = vrot.slane %v908_v10, %v1916_v30 }
 0x121   : > { %860 = vrot.lane.b32.xlu0 %v851_v43, %s1775_s15 }
 0x122   : > { %827 = vrot.lane.b32.xlu1 %v818_v44, %s1776_s16 }
 0x125   : > { %685 = vrot.lane.b32.xlu0 %v682_v46, %s1772_s12 }
 0x126   : > { %687 = vrot.lane.b32.xlu1 %v681_v47, %s1772_s12 }
 0x129   : > { %718 = vrot.lane.b32.xlu0 %v715_v49, %s1771_s30 }
 0x12a   : > { %720 = vrot.lane.b32.xlu1 %v714_v51, %s1771_s30 }
 0x12d   : > { %751 = vrot.lane.b32.xlu0 %v745_v52, %s1774_s14 }
 0x12e   : > { %749 = vrot.lane.b32.xlu1 %v746_v54, %s1774_s14 }
 0x131   : > { %784 = vrot.lane.b32.xlu0 %v778_v55, %s1773_s13 }
 0x132   : > { %782 = vrot.lane.b32.xlu1 %v779_v57, %s1773_s13 }
 0x135   : > { %831 = vrot.lane.b32.xlu0 %v825_v58, %s1776_s16 }
 0x136   : > { %829 = vrot.lane.b32.xlu1 %v826_v59, %s1776_s16 }
 0x139   : > { %862 = vrot.lane.b32.xlu0 %v859_v62, %s1775_s15 }
 0x13a   : > { %864 = vrot.lane.b32.xlu1 %v858_v1, %s1775_s15 }
 0x13d   : > { %897 = vrot.lane.b32.xlu0 %v891_v4, %s1777_s19 }
 0x13e   : > { %895 = vrot.lane.b32.xlu1 %v892_v6, %s1777_s19 }
 0x141   : > { %926 = vrot.lane.b32.xlu0 %v923_v9, %s1778_s20 }
 0x142   : > { %893 = vrot.lane.b32.xlu1 %v884_v2, %s1777_s19 }
 0x145   : > { %924 = vrot.lane.b32.xlu0 %v915_v5, %s1778_s20 }
 0x146   : > { %928 = vrot.lane.b32.xlu1 %v922_v11, %s1778_s20 }
 0x14a   : > { %961 = vperm.xlu1 %1702, %v958_v12  }
 0x18b   : > { %v717_v13 = vpop.permute.xlu0 %716 }
 0x18c   : > { %v684_v15 = vpop.permute.xlu1 %683 }
 0x18f   : > { %v781_v16 = vpop.permute.xlu0 %780 }
 0x190   : > { %v748_v18 = vpop.permute.xlu1 %747 }
 0x193   : > { %v861_v20 = vpop.permute.xlu0 %860 }
 0x194   : > { %v828_v25 = vpop.permute.xlu1 %827 }
 0x197   : > { %v686_v27 = vpop.permute.xlu0 %685 }
 0x198   : > { %v690_v24 = vsel %vm689_vm9, %v684_v15, %v686_v27  ;;  %v688_v29 = vpop.permute.xlu1 %687 }
 0x199   : > { %v694_v31 = vsel %vm1962_vm10, %v690_v24, 0.0  ;;  %v691_v32 = vsel %vm689_vm9, %v686_v27, %v688_v29 }
 0x19a   : > { %696 = vst [vmem:[#allocation3] sm:$0x3] %v694_v31  ;;  %v695_v33 = vsel %vm1966_vm11, %v691_v32, 0.0 }
 0x19b   : > { %697 = vst [vmem:[#allocation3 + $0x8] sm:$0x3] %v695_v33  ;;  %v719_v34 = vpop.permute.xlu0 %718 }
 0x19c   : > { %v723_v35 = vsel %vm722_vm12, %v717_v13, %v719_v34  ;;  %v721_v36 = vpop.permute.xlu1 %720 }
 0x19d   : > { %727 = vst [vmem:[#allocation3 + $0x10] sm:$0x3] %v723_v35  ;;  %v724_v37 = vsel %vm722_vm12, %v719_v34, %v721_v36 }
 0x19e   : > { %728 = vst [vmem:[#allocation3 + $0x18] sm:$0x3] %v724_v37 }
 0x19f   : > { %v752_v38 = vpop.permute.xlu0 %751 }
 0x1a0   : > { %v750_v41 = vpop.permute.xlu1 %749 }
 0x1a1   : > { %v754_v42 = vsel %vm753_vm13, %v748_v18, %v750_v41  ;;  %v755_v43 = vsel %vm753_vm13, %v750_v41, %v752_v38  ;;  %v940_v48 = vld [vmem:[#allocation3] sm:$0xff] }
 0x1a2   : > { %v758_v44 = vsel %vm1978_vm14, %v754_v42, 0.0  ;;  %v759_v45 = vsel %vm1982_vm15, %v755_v43, 0.0  ;;  %v941_v52 = vld [vmem:[#allocation3 + $0x8] sm:$0xff]  ;;  %v948_v18 = vld [vmem:[#allocation3 + $0x40] sm:$0xff] }
 0x1a3   : > { %760 = vst [vmem:[#allocation3 + $0x20] sm:$0x3] %v758_v44  ;;  %761 = vst [vmem:[#allocation3 + $0x28] sm:$0x3] %v759_v45  ;;  %v785_v46 = vpop.permute.xlu0 %784 }
 0x1a4   : > { %v783_v47 = vpop.permute.xlu1 %782  ;;  %v942_v49 = vld [vmem:[#allocation3 + $0x10] sm:$0xff] }
 0x1a5   : > { %v787_v50 = vsel %vm786_vm0, %v781_v16, %v783_v47  ;;  %v788_v51 = vsel %vm786_vm0, %v783_v47, %v785_v46  ;;  %v943_v53 = vld [vmem:[#allocation3 + $0x18] sm:$0xff]  ;;  %v1648_v54 = vpack.c.bf16 %v942_v49, %v940_v48 }
 0x1a6   : > { %v791_v55 = vsel %vm1962_vm10, %v787_v50, 0.0  ;;  %v792_v56 = vsel %vm1966_vm11, %v788_v51, 0.0  ;;  %v1646_v57 = vpack.c.bf16 %v943_v53, %v941_v52  ;;  %v939_v48 = vld [vmem:[%s2136_s5] sm:$0x3] }
 0x1a7   : > { %793 = vst [vmem:[#allocation3 + $0x30] sm:$0x3] %v791_v55  ;;  %794 = vst [vmem:[#allocation3 + $0x38] sm:$0x3] %v792_v56  ;;  %v832_v58 = vpop.permute.xlu0 %831 }
 0x1a8   : > { %1647 = vmatprep.subr.bf16.mxu0 %v1646_v57  ;;  %v830_v59 = vpop.permute.xlu1 %829 }
 0x1a9   : > { %v834_v60 = vsel %vm833_vm1, %v828_v25, %v830_v59  ;;  %v835_v61 = vsel %vm833_vm1, %v830_v59, %v832_v58  ;;  %1649 = vmatpush1.bf16.msra.mxu0 %v1648_v54 }
 0x1aa   : > { %v838_v62 = vsel %vm1978_vm14, %v834_v60, 0.0  ;;  %v839_v63 = vsel %vm1982_vm15, %v835_v61, 0.0  ;;  %v945_v6 = vld [vmem:[#allocation3 + $0x28] sm:$0xff]  ;;  %v944_v11 = vld [vmem:[#allocation3 + $0x20] sm:$0xff] }
 0x1ab   : > { %840 = vst [vmem:[#allocation3 + $0x50] sm:$0x3] %v838_v62  ;;  %841 = vst [vmem:[#allocation3 + $0x58] sm:$0x3] %v839_v63  ;;  %v863_v1 = vpop.permute.xlu0 %862 }
 0x1ac   : > { %v867_v2 = vsel %vm866_vm2, %v861_v20, %v863_v1  ;;  %v865_v3 = vpop.permute.xlu1 %864 }
 0x1ad   : > { %v871_v4 = vsel %vm1962_vm10, %v867_v2, 0.0  ;;  %v868_v5 = vsel %vm866_vm2, %v863_v1, %v865_v3 }
 0x1ae   : > { %873 = vst [vmem:[#allocation3 + $0x60] sm:$0x3] %v871_v4  ;;  %v872_v9 = vsel %vm1966_vm11, %v868_v5, 0.0  ;;  %v947_v10 = vld [vmem:[#allocation3 + $0x38] sm:$0xff]  ;;  %v946_v12 = vld [vmem:[#allocation3 + $0x30] sm:$0xff] }
 0x1af   : > { %874 = vst [vmem:[#allocation3 + $0x68] sm:$0x3] %v872_v9  ;;  %v898_v13 = vpop.permute.xlu0 %897  ;;  %v1650_v14 = vpack.c.bf16 %v947_v10, %v945_v6  ;;  %v1652_v15 = vpack.c.bf16 %v946_v12, %v944_v11 }
 0x1b0   : > { %v896_v16 = vpop.permute.xlu1 %895 }
 0x1b1   : > { %v901_v17 = vsel %vm899_vm3, %v896_v16, %v898_v13  ;;  %1651 = vmatprep.subr.bf16.mxu0 %v1650_v14 }
 0x1b2   : > { %905 = vst [vmem:[#allocation3 + $0x78] sm:$0x3] %v901_v17  ;;  %1653 = vmatpush1.bf16.msra.mxu0 %v1652_v15  ;;  %v951_v20 = vld [vmem:[#allocation3 + $0x58] sm:$0xff]  ;;  %v950_v21 = vld [vmem:[#allocation3 + $0x50] sm:$0xff] }
 0x1b3   : > { %v927_v25 = vpop.permute.xlu0 %926  ;;  %v1654_v27 = vpack.c.bf16 %v951_v20, %v949_v19  ;;  %v1656_v24 = vpack.c.bf16 %v950_v21, %v948_v18 }
 0x1b4   : > { %v894_v29 = vpop.permute.xlu1 %893 }
 0x1b5   : > { %v900_v31 = vsel %vm899_vm3, %v894_v29, %v896_v16  ;;  %1655 = vmatprep.subr.bf16.mxu0 %v1654_v27  ;;  %v952_v43 = vld [vmem:[#allocation3 + $0x60] sm:$0xff] }
 0x1b6   : > { %904 = vst [vmem:[#allocation3 + $0x70] sm:$0x3] %v900_v31  ;;  %1657 = vmatpush1.bf16.msra.mxu0 %v1656_v24  ;;  %v953_v37 = vld [vmem:[#allocation3 + $0x68] sm:$0xff] }
 0x1b7   : > { %v925_v32 = vpop.permute.xlu0 %924 }
 0x1b8   : > { %v931_v33 = vsel %vm930_vm4, %v925_v32, %v927_v25  ;;  %v929_v34 = vpop.permute.xlu1 %928 }
 0x1b9   : > { %v935_v35 = vsel %vm1978_vm14, %v931_v33, 0.0  ;;  %v932_v36 = vsel %vm930_vm4, %v927_v25, %v929_v34  ;;  %v955_v38 = vld [vmem:[#allocation3 + $0x78] sm:$0xff] }
 0x1ba   : > { %937 = vst [vmem:[#allocation3 + $0x80] sm:$0x3] %v935_v35  ;;  %v936_v41 = vsel %vm1982_vm15, %v932_v36, 0.0  ;;  %v1658_v42 = vpack.c.bf16 %v955_v38, %v953_v37 }
 0x1bb   : > { %938 = vst [vmem:[#allocation3 + $0x88] sm:$0x3] %v936_v41 }
 0x1bc   : > { %1659 = vmatprep.subr.bf16.mxu0 %v1658_v42 }
 0x1bd   : > { %v954_v44 = vld [vmem:[#allocation3 + $0x70] sm:$0xff] }
 0x1be   : > { %v1660_v45 = vpack.c.bf16 %v954_v44, %v952_v43 }
 0x1c0   : > { %1661 = vmatpush1.bf16.msra.mxu0 %v1660_v45 }
 0x1c1   : > { %v956_v46 = vld [vmem:[#allocation3 + $0x80] sm:$0xff] }
 0x1c2   : > { %v957_v47 = vld [vmem:[#allocation3 + $0x88] sm:$0xff] }
 0x1c3   : > { %984 = vmatprep.subr.mxu0 %v957_v47 }
 0x1c4   : > { %985 = vmatpush1.msra.mxu0 %v956_v46 }
 0x1c5   : > { %1631 = vmatmul.mubr.msk.f32.vlgmr.msra.gmra.mrb[0].mxu0 %vm964_vm5, %v939_v48 }
 0x1c6   : > { %1529 = vmatprep.mubr.f32.mxu0 %v1768_v0 }
 0x1c9   : > { %v962_v49 = vpop.permute.xlu1 %961 }
 0x298   : > { %v1034_v50 = vpop.f32.mrb[0].mxu0 }
 0x299   : > { %v1035_v51 = vadd.f32 %v1034_v50, %v962_v49  ;;  %v1036_v52 = vpop.f32.mrb[1].mxu0 }
 0x29a   : > { %v1037_v53 = vadd.f32 %v1036_v52, %v962_v49  ;;  %v452_v52 = vld [vmem:[%s2133_s2] sm:$0x3] }
 0x29b   : > { %v1632_v54 = vmul.f32 -1.442695, %v1035_v51 }
 0x29c   : > { %v1633_v55 = vmul.f32 -1.442695, %v1037_v53 }
 0x29d   : > { %1728 = vpow2.f32 %v1632_v54  ;;  %v1455_v54 = vld [vmem:[%s2141_s10] sm:$0xf] }
 0x29e   : > { %1730 = vpow2.f32 %v1633_v55 }
 0x2a7   : > { %v1729_v56 = vpop.eup %1728 }
 0x2a8   : > { %v1731_v57 = vpop.eup %1730  ;;  %v1045_v58 = vadd.f32 1.0, %v1729_v56 }
 0x2a9   : > { %v1046_v59 = vadd.f32 1.0, %v1731_v57 }
 0x2aa   : > { %1732 = vrcp.f32 %v1045_v58 }
 0x2ab   : > { %1734 = vrcp.f32 %v1046_v59 }
 0x2b4   : > { %v1733_v60 = vpop.eup %1732 }
 0x2b5   : > { %v1735_v61 = vpop.eup %1734  ;;  %v1051_v62 = vmul.f32 %v1733_v60, %v1035_v51 }
 0x2b6   : > { %v1052_v63 = vmul.f32 %v1735_v61, %v1037_v53  ;;  %v1350_v53 = vld [vmem:[%s2139_s8] sm:$0x3] }
 0x2b8   : > { %v1055_v0 = vcombine.low %v1051_v62, %v1052_v63 }
 0x2ba   : > { %1634 = vst.sshfl [vmem:[#allocation2 + $0x2] sm:$0x33 pattern:$0x76325410] %v1055_v0 }
 0x2c1   : > { %v1097_v1 = vld [vmem:[#allocation2] sm:$0x3f] }
 0x2c2   : > { %v1065_v2 = vld [vmem:[#allocation2] sm:$0x3f]  ;;  %v1106_v3 = vrot.slane %v1097_v1, %v1916_v30  ;;  %v1099_v20 = vcombine.high %v1097_v1, %v1097_v1 }
 0x2c3   : > { %v1074_v4 = vrot.slane %v1065_v2, %v1916_v30  ;;  %v1159_v5 = vld [vmem:[#allocation2] sm:$0x3f]  ;;  %v1067_v16 = vcombine.high %v1065_v2, %v1065_v2 }
 0x2c4   : > { %v1127_v6 = vld [vmem:[#allocation2] sm:$0x3f]  ;;  %1115 = vrot.lane.b32.xlu1 %v1106_v3, %s1771_s30  ;;  %v1168_v10 = vrot.slane %v1159_v5, %v1916_v30  ;;  %v1113_v21 = vrot.slane %v1099_v20, %v1916_v30  ;;  %v1114_v25 = vcombine.high %v1106_v3, %v1106_v3  ;;  %v1161_v31 = vcombine.high %v1159_v5, %v1159_v5 }
 0x2c5   : > { %1083 = vrot.lane.b32.xlu0 %v1074_v4, %s1772_s12  ;;  %v1635_v9 = vld.sshfl [vmem:[#allocation2 + $0x2] sm:$0x33 pattern:$0x76325410]  ;;  %v1136_v11 = vrot.slane %v1127_v6, %v1916_v30  ;;  %v1082_v18 = vcombine.high %v1074_v4, %v1074_v4  ;;  %v1081_v19 = vrot.slane %v1067_v16, %v1916_v30  ;;  %v1129_v27 = vcombine.high %v1127_v6, %v1127_v6 }
 0x2c6   : > { %1203 = vst [vmem:[#allocation3 + $0x40] sm:$0x3] %v1635_v9  ;;  %v1237_v12 = vld [vmem:[#allocation2 + $0x2] sm:$0x3f]  ;;  %v1200_v17 = vcombine.high %v1635_v9, %v1635_v9  ;;  %v1176_v32 = vcombine.high %v1168_v10, %v1168_v10  ;;  %v1175_v33 = vrot.slane %v1161_v31, %v1916_v30 }
 0x2c7   : > { %v1205_v13 = vld [vmem:[#allocation2 + $0x2] sm:$0x3f]  ;;  %v1246_v14 = vrot.slane %v1237_v12, %v1916_v30  ;;  %v1144_v24 = vcombine.high %v1136_v11, %v1136_v11  ;;  %v1143_v29 = vrot.slane %v1129_v27, %v1916_v30  ;;  %v1239_v37 = vcombine.high %v1237_v12, %v1237_v12 }
 0x2c8   : > { %1177 = vrot.lane.b32.xlu1 %v1168_v10, %s1773_s13  ;;  %v1214_v15 = vrot.slane %v1205_v13, %v1916_v30  ;;  %1204 = vst [vmem:[#allocation3 + $0x48] sm:$0x3] %v1200_v17  ;;  %v1207_v34 = vcombine.high %v1205_v13, %v1205_v13  ;;  %v1269_v38 = vld [vmem:[#allocation2 + $0x2] sm:$0x3f] }
 0x2c9   : > { %1145 = vrot.lane.b32.xlu0 %v1136_v11, %s1774_s14  ;;  %v1253_v41 = vrot.slane %v1239_v37, %v1916_v30  ;;  %v1254_v42 = vcombine.high %v1246_v14, %v1246_v14  ;;  %v1278_v43 = vrot.slane %v1269_v38, %v1916_v30  ;;  %v1271_v44 = vcombine.high %v1269_v38, %v1269_v38  ;;  %v1299_v45 = vld [vmem:[#allocation2 + $0x2] sm:$0x3f] }
 0x2ca   : > { %v1222_v35 = vcombine.high %v1214_v15, %v1214_v15  ;;  %v1221_v36 = vrot.slane %v1207_v34, %v1916_v30  ;;  %v1308_v48 = vrot.slane %v1299_v45, %v1916_v30  ;;  %v1301_v50 = vcombine.high %v1299_v45, %v1299_v45 }
 0x2cb   : > { %v1286_v46 = vcombine.high %v1278_v43, %v1278_v43  ;;  %v1285_v47 = vrot.slane %v1271_v44, %v1916_v30 }
 0x2cc   : > { %1255 = vrot.lane.b32.xlu1 %v1246_v14, %s1775_s15  ;;  %v1316_v49 = vcombine.high %v1308_v48, %v1308_v48  ;;  %v1315_v51 = vrot.slane %v1301_v50, %v1916_v30 }
 0x2cd   : > { %1223 = vrot.lane.b32.xlu0 %v1214_v15, %s1776_s16 }
 0x2cf   : > { %v1341_v26 = vld [vmem:[#allocation3 + $0x48] sm:$0xff] }
 0x2d0   : > { %1087 = vrot.lane.b32.xlu1 %v1081_v19, %s1772_s12 }
 0x2d1   : > { %1085 = vrot.lane.b32.xlu0 %v1082_v18, %s1772_s12 }
 0x2d4   : > { %1117 = vrot.lane.b32.xlu1 %v1114_v25, %s1771_s30 }
 0x2d5   : > { %1119 = vrot.lane.b32.xlu0 %v1113_v21, %s1771_s30 }
 0x2d8   : > { %1149 = vrot.lane.b32.xlu1 %v1143_v29, %s1774_s14 }
 0x2d9   : > { %1147 = vrot.lane.b32.xlu0 %v1144_v24, %s1774_s14 }
 0x2dc   : > { %1181 = vrot.lane.b32.xlu1 %v1175_v33, %s1773_s13 }
 0x2dd   : > { %1179 = vrot.lane.b32.xlu0 %v1176_v32, %s1773_s13 }
 0x2e0   : > { %1227 = vrot.lane.b32.xlu1 %v1221_v36, %s1776_s16 }
 0x2e1   : > { %1225 = vrot.lane.b32.xlu0 %v1222_v35, %s1776_s16 }
 0x2e4   : > { %1257 = vrot.lane.b32.xlu1 %v1254_v42, %s1775_s15 }
 0x2e5   : > { %1259 = vrot.lane.b32.xlu0 %v1253_v41, %s1775_s15 }
 0x2e8   : > { %1291 = vrot.lane.b32.xlu1 %v1285_v47, %s1777_s19 }
 0x2e9   : > { %1289 = vrot.lane.b32.xlu0 %v1286_v46, %s1777_s19 }
 0x2ec   : > { %1319 = vrot.lane.b32.xlu1 %v1316_v49, %s1778_s20 }
 0x2ed   : > { %1287 = vrot.lane.b32.xlu0 %v1278_v43, %s1777_s19 }
 0x2f0   : > { %1317 = vrot.lane.b32.xlu1 %v1308_v48, %s1778_s20 }
 0x2f1   : > { %1321 = vrot.lane.b32.xlu0 %v1315_v51, %s1778_s20 }
 0x2f4   : > { %1353 = vperm.xlu1 %1702, %v1350_v53  }
 0x2f5   : > { %455 = vperm.xlu0 %1701, %v452_v52  }
 0x2f9   : > { %1458 = vperm.xlu0 %1701, %v1455_v54   ;;  %v1340_v54 = vld [vmem:[#allocation3 + $0x40] sm:$0xff] }
 0x336   : > { %v1116_v30 = vpop.permute.xlu1 %1115 }
 0x337   : > { %v1084_v55 = vpop.permute.xlu0 %1083 }
 0x33a   : > { %v1178_v56 = vpop.permute.xlu1 %1177 }
 0x33b   : > { %v1146_v57 = vpop.permute.xlu0 %1145 }
 0x33e   : > { %v1256_v58 = vpop.permute.xlu1 %1255 }
 0x33f   : > { %v1224_v59 = vpop.permute.xlu0 %1223 }
 0x342   : > { %v1088_v61 = vpop.permute.xlu1 %1087 }
 0x343   : > { %v1086_v60 = vpop.permute.xlu0 %1085 }
 0x344   : > { %v1089_v62 = vsel %vm689_vm9, %v1084_v55, %v1086_v60  ;;  %v1090_v63 = vsel %vm689_vm9, %v1086_v60, %v1088_v61 }
 0x345   : > { %v1093_v0 = vsel %vm1962_vm10, %v1089_v62, 0.0  ;;  %v1094_v1 = vsel %vm1966_vm11, %v1090_v63, 0.0 }
 0x346   : > { %1095 = vst [vmem:[#allocation3] sm:$0x3] %v1093_v0  ;;  %1096 = vst [vmem:[#allocation3 + $0x8] sm:$0x3] %v1094_v1  ;;  %v1118_v3 = vpop.permute.xlu1 %1117 }
 0x347   : > { %v1120_v2 = vpop.permute.xlu0 %1119  ;;  %v1121_v4 = vsel %vm722_vm12, %v1116_v30, %v1118_v3 }
 0x348   : > { %v1122_v5 = vsel %vm722_vm12, %v1118_v3, %v1120_v2  ;;  %1125 = vst [vmem:[#allocation3 + $0x10] sm:$0x3] %v1121_v4 }
 0x349   : > { %1126 = vst [vmem:[#allocation3 + $0x18] sm:$0x3] %v1122_v5 }
 0x34a   : > { %v1150_v9 = vpop.permute.xlu1 %1149 }
 0x34b   : > { %v1148_v6 = vpop.permute.xlu0 %1147 }
 0x34c   : > { %v1151_v10 = vsel %vm753_vm13, %v1146_v57, %v1148_v6  ;;  %v1152_v11 = vsel %vm753_vm13, %v1148_v6, %v1150_v9 }
 0x34d   : > { %v1155_v12 = vsel %vm1978_vm14, %v1151_v10, 0.0  ;;  %v1156_v13 = vsel %vm1982_vm15, %v1152_v11, 0.0  ;;  %v1333_v16 = vld [vmem:[#allocation3 + $0x8] sm:$0xff]  ;;  %v1332_v20 = vld [vmem:[#allocation3] sm:$0xff] }
 0x34e   : > { %1157 = vst [vmem:[#allocation3 + $0x20] sm:$0x3] %v1155_v12  ;;  %1158 = vst [vmem:[#allocation3 + $0x28] sm:$0x3] %v1156_v13  ;;  %v1182_v15 = vpop.permute.xlu1 %1181  ;;  %v1331_v12 = vld [vmem:[%s2138_s7] sm:$0x3] }
 0x34f   : > { %v1180_v14 = vpop.permute.xlu0 %1179  ;;  %v1334_v21 = vld [vmem:[#allocation3 + $0x10] sm:$0xff] }
 0x350   : > { %v1183_v17 = vsel %vm786_vm0, %v1178_v56, %v1180_v14  ;;  %v1184_v18 = vsel %vm786_vm0, %v1180_v14, %v1182_v15  ;;  %v1335_v19 = vld [vmem:[#allocation3 + $0x18] sm:$0xff]  ;;  %v1664_v29 = vpack.c.bf16 %v1334_v21, %v1332_v20 }
 0x351   : > { %v1187_v25 = vsel %vm1962_vm10, %v1183_v17, 0.0  ;;  %v1188_v27 = vsel %vm1966_vm11, %v1184_v18, 0.0  ;;  %v1662_v24 = vpack.c.bf16 %v1335_v19, %v1333_v16 }
 0x352   : > { %1189 = vst [vmem:[#allocation3 + $0x30] sm:$0x3] %v1187_v25  ;;  %1190 = vst [vmem:[#allocation3 + $0x38] sm:$0x3] %v1188_v27  ;;  %v1228_v32 = vpop.permute.xlu1 %1227 }
 0x353   : > { %v1226_v31 = vpop.permute.xlu0 %1225  ;;  %1663 = vmatprep.subr.bf16.mxu1 %v1662_v24 }
 0x354   : > { %v1229_v33 = vsel %vm833_vm1, %v1224_v59, %v1226_v31  ;;  %v1230_v34 = vsel %vm833_vm1, %v1226_v31, %v1228_v32  ;;  %1665 = vmatpush1.bf16.msra.mxu1 %v1664_v29 }
 0x355   : > { %v1233_v35 = vsel %vm1978_vm14, %v1229_v33, 0.0  ;;  %v1234_v36 = vsel %vm1982_vm15, %v1230_v34, 0.0  ;;  %v1337_v43 = vld [vmem:[#allocation3 + $0x28] sm:$0xff]  ;;  %v1336_v47 = vld [vmem:[#allocation3 + $0x20] sm:$0xff] }
 0x356   : > { %1235 = vst [vmem:[#allocation3 + $0x50] sm:$0x3] %v1233_v35  ;;  %1236 = vst [vmem:[#allocation3 + $0x58] sm:$0x3] %v1234_v36  ;;  %v1258_v38 = vpop.permute.xlu1 %1257 }
 0x357   : > { %v1260_v37 = vpop.permute.xlu0 %1259  ;;  %v1261_v41 = vsel %vm866_vm2, %v1256_v58, %v1258_v38 }
 0x358   : > { %v1262_v42 = vsel %vm866_vm2, %v1258_v38, %v1260_v37  ;;  %v1265_v44 = vsel %vm1962_vm10, %v1261_v41, 0.0 }
 0x359   : > { %v1266_v45 = vsel %vm1966_vm11, %v1262_v42, 0.0  ;;  %v1339_v46 = vld [vmem:[#allocation3 + $0x38] sm:$0xff]  ;;  %v1338_v48 = vld [vmem:[#allocation3 + $0x30] sm:$0xff]  ;;  %1267 = vst [vmem:[#allocation3 + $0x60] sm:$0x3] %v1265_v44 }
 0x35a   : > { %1268 = vst [vmem:[#allocation3 + $0x68] sm:$0x3] %v1266_v45  ;;  %v1666_v49 = vpack.c.bf16 %v1339_v46, %v1337_v43  ;;  %v1668_v50 = vpack.c.bf16 %v1338_v48, %v1336_v47  ;;  %v1292_v52 = vpop.permute.xlu1 %1291 }
 0x35b   : > { %v1290_v51 = vpop.permute.xlu0 %1289 }
 0x35c   : > { %v1294_v53 = vsel %vm899_vm3, %v1290_v51, %v1292_v52  ;;  %1667 = vmatprep.subr.bf16.mxu1 %v1666_v49 }
 0x35d   : > { %1298 = vst [vmem:[#allocation3 + $0x78] sm:$0x3] %v1294_v53  ;;  %1669 = vmatpush1.bf16.msra.mxu1 %v1668_v50  ;;  %v1343_v30 = vld [vmem:[#allocation3 + $0x58] sm:$0xff]  ;;  %v1342_v55 = vld [vmem:[#allocation3 + $0x50] sm:$0xff] }
 0x35e   : > { %v1670_v28 = vpack.c.bf16 %v1343_v30, %v1341_v26  ;;  %v1672_v56 = vpack.c.bf16 %v1342_v55, %v1340_v54  ;;  %v1320_v58 = vpop.permute.xlu1 %1319  ;;  %v1448_v53 = vld [vmem:[%s2140_s9] sm:$0xf] }
 0x35f   : > { %v1288_v57 = vpop.permute.xlu0 %1287 }
 0x360   : > { %v1293_v59 = vsel %vm899_vm3, %v1288_v57, %v1290_v51  ;;  %1671 = vmatprep.subr.bf16.mxu1 %v1670_v28  ;;  %v1344_v5 = vld [vmem:[#allocation3 + $0x60] sm:$0xff] }
 0x361   : > { %1297 = vst [vmem:[#allocation3 + $0x70] sm:$0x3] %v1293_v59  ;;  %1673 = vmatpush1.bf16.msra.mxu1 %v1672_v56  ;;  %v1345_v0 = vld [vmem:[#allocation3 + $0x68] sm:$0xff] }
 0x362   : > { %v1318_v61 = vpop.permute.xlu1 %1317 }
 0x363   : > { %v1322_v60 = vpop.permute.xlu0 %1321  ;;  %v1323_v63 = vsel %vm930_vm4, %v1318_v61, %v1320_v58 }
 0x364   : > { %v1324_v62 = vsel %vm930_vm4, %v1320_v58, %v1322_v60  ;;  %v1347_v1 = vld [vmem:[#allocation3 + $0x78] sm:$0xff]  ;;  %v1327_v3 = vsel %vm1978_vm14, %v1323_v63, 0.0 }
 0x365   : > { %v1328_v2 = vsel %vm1982_vm15, %v1324_v62, 0.0  ;;  %v1674_v4 = vpack.c.bf16 %v1347_v1, %v1345_v0  ;;  %1329 = vst [vmem:[#allocation3 + $0x80] sm:$0x3] %v1327_v3 }
 0x366   : > { %1330 = vst [vmem:[#allocation3 + $0x88] sm:$0x3] %v1328_v2 }
 0x367   : > { %1675 = vmatprep.subr.bf16.mxu1 %v1674_v4 }
 0x368   : > { %v1346_v6 = vld [vmem:[#allocation3 + $0x70] sm:$0xff] }
 0x369   : > { %v1676_v9 = vpack.c.bf16 %v1346_v6, %v1344_v5 }
 0x36b   : > { %1677 = vmatpush1.bf16.msra.mxu1 %v1676_v9 }
 0x36c   : > { %v1348_v11 = vld [vmem:[#allocation3 + $0x80] sm:$0xff] }
 0x36d   : > { %v1349_v10 = vld [vmem:[#allocation3 + $0x88] sm:$0xff] }
 0x36e   : > { %1375 = vmatprep.subr.mxu1 %v1349_v10 }
 0x36f   : > { %1376 = vmatpush1.msra.mxu1 %v1348_v11 }
 0x370   : > { %1636 = vmatmul.mubr.msk.f32.vlgmr.msra.gmra.mrb[4].mxu1 %vm964_vm5, %v1331_v12 }
 0x373   : > { %v1354_v33 = vpop.permute.xlu1 %1353 }
 0x374   : > { %v456_v39 = vpop.permute.xlu0 %455 }
 0x375   : > { %v536_v40 = vadd.f32 %v1903_v7, %v456_v39  ;;  %v538_v13 = vadd.f32 %v1905_v8, %v456_v39  ;;  %v1451_v7 = vld [vmem:[#allocation4 + $0x10] sm:$0xff]  ;;  %v1452_v8 = vld [vmem:[#allocation4 + $0x18] sm:$0xff] }
 0x377   : > { %v1622_v14 = vmul.f32 -1.442695, %v536_v40  ;;  %v1623_v15 = vmul.f32 -1.442695, %v538_v13 }
 0x378   : > { %v1459_v26 = vpop.permute.xlu0 %1458 }
 0x379   : > { %1736 = vpow2.f32 %v1622_v14 }
 0x37a   : > { %1738 = vpow2.f32 %v1623_v15 }
 0x383   : > { %v1737_v16 = vpop.eup %1736 }
 0x384   : > { %v1739_v17 = vpop.eup %1738  ;;  %v546_v18 = vadd.f32 1.0, %v1737_v16 }
 0x385   : > { %v547_v19 = vadd.f32 1.0, %v1739_v17 }
 0x386   : > { %1740 = vrcp.f32 %v546_v18 }
 0x387   : > { %1742 = vrcp.f32 %v547_v19 }
 0x390   : > { %v1741_v20 = vpop.eup %1740 }
 0x391   : > { %v1743_v21 = vpop.eup %1742  ;;  %v552_v25 = vmul.f32 %v1741_v20, %v536_v40 }
 0x392   : > { %v553_v27 = vmul.f32 %v1743_v21, %v538_v13 }
 0x393   : > { %649 = vst [vmem:[#allocation4] sm:$0x3] %v552_v25 }
 0x394   : > { %650 = vst [vmem:[#allocation4 + $0x8] sm:$0x3] %v553_v27 }
 0x39a   : > { %v1449_v24 = vld [vmem:[#allocation4] sm:$0xff] }
 0x39b   : > { %v1450_v29 = vld [vmem:[#allocation4 + $0x8] sm:$0xff]  ;;  %v1680_v31 = vpack.c.bf16 %v1451_v7, %v1449_v24 }
 0x39c   : > { %v1678_v32 = vpack.c.bf16 %v1452_v8, %v1450_v29 }
 0x39e   : > { %1679 = vmatprep.subr.bf16.mxu0 %v1678_v32 }
 0x39f   : > { %1681 = vmatpush1.bf16.msra.mxu0 %v1680_v31 }
 0x443   : > { %v1425_v34 = vpop.f32.mrb[4].mxu1 }
 0x444   : > { %v1426_v35 = vadd.f32 %v1425_v34, %v1354_v33  ;;  %v1427_v36 = vpop.f32.mrb[5].mxu1 }
 0x445   : > { %v1428_v37 = vadd.f32 %v1427_v36, %v1354_v33 }
 0x446   : > { %v1637_v38 = vmul.f32 -1.442695, %v1426_v35 }
 0x447   : > { %v1638_v41 = vmul.f32 -1.442695, %v1428_v37 }
 0x448   : > { %1744 = vpow2.f32 %v1637_v38 }
 0x449   : > { %1746 = vpow2.f32 %v1638_v41 }
 0x452   : > { %v1745_v42 = vpop.eup %1744 }
 0x453   : > { %v1747_v43 = vpop.eup %1746  ;;  %v1436_v44 = vadd.f32 1.0, %v1745_v42 }
 0x454   : > { %v1437_v45 = vadd.f32 1.0, %v1747_v43 }
 0x455   : > { %1748 = vrcp.f32 %v1436_v44 }
 0x456   : > { %1750 = vrcp.f32 %v1437_v45 }
 0x45f   : > { %v1749_v46 = vpop.eup %1748 }
 0x460   : > { %v1751_v47 = vpop.eup %1750  ;;  %v1442_v48 = vmul.f32 %v1749_v46, %v1426_v35 }
 0x461   : > { %v1443_v49 = vmul.f32 %v1751_v47, %v1428_v37 }
 0x462   : > { %v1444_v50 = vadd.f32 %v1442_v48, %v1907_v22 }
 0x463   : > { %v1445_v51 = vadd.f32 %v1443_v49, %v1909_v23 }
 0x464   : > { %1446 = vst [vmem:[#allocation4 + $0x20] sm:$0x3] %v1444_v50 }
 0x465   : > { %1447 = vst [vmem:[#allocation4 + $0x28] sm:$0x3] %v1445_v51 }
 0x46b   : > { %v1453_v54 = vld [vmem:[#allocation4 + $0x20] sm:$0xff] }
 0x46c   : > { %v1454_v52 = vld [vmem:[#allocation4 + $0x28] sm:$0xff] }
 0x46d   : > { %1469 = vmatprep.subr.mxu0 %v1454_v52 }
 0x46e   : > { %1470 = vmatpush1.msra.mxu0 %v1453_v54 }
 0x46f   : > { %1639 = vmatmul.mubr.msk.f32.vlgmr.msra.gmra.mrb[2].mxu0 %vm1461_vm6, %v1448_v53 }
 0x542   : > { %v1531_v30 = vpop.f32.mrb[2].mxu0 }
 0x543   : > { %v1532_v55 = vadd.f32 %v1531_v30, %v1459_v26  ;;  %v1533_v28 = vpop.f32.mrb[3].mxu0 }
 0x544   : > { %v1534_v22 = vadd.f32 %v1533_v28, %v1459_v26 }
 0x545   : > { %v1640_v56 = vmul.f32 -1.442695, %v1532_v55 }
 0x546   : > { %v1641_v23 = vmul.f32 -1.442695, %v1534_v22 }
 0x547   : > { %1752 = vpow2.f32 %v1640_v56 }
 0x548   : > { %1754 = vpow2.f32 %v1641_v23 }
 0x551   : > { %v1753_v57 = vpop.eup %1752 }
 0x552   : > { %v1755_v58 = vpop.eup %1754  ;;  %v1542_v59 = vadd.f32 1.0, %v1753_v57 }
 0x553   : > { %v1543_v60 = vadd.f32 1.0, %v1755_v58 }
 0x554   : > { %1756 = vrcp.f32 %v1542_v59 }
 0x555   : > { %1758 = vrcp.f32 %v1543_v60 }
 0x55e   : > { %v1757_v61 = vpop.eup %1756 }
 0x55f   : > { %v1759_v62 = vpop.eup %1758  ;;  %v1548_v63 = vmul.f32 %v1757_v61, %v1532_v55 }
 0x560   : > { %v1549_v0 = vmul.f32 %v1759_v62, %v1534_v22 }
 0x562   : > { %v1552_v1 = vcombine.low %v1548_v63, %v1549_v0 }
 0x564   : > { %1554 = vst [vmem:[%s386_s21] sm:$0xff] %v1552_v1 }
 0x565 PF: > { %s21_s17 = sadd.s32 1, %s1766_s17  }
 0x566   : > { %p18_p4 = scmp.ge.s32.totalorder %s21_s17, 4  }
 0x568   :  { %20 = sbr.rel (!%p18_p4) target bundleno = 1 (0x1), region = 94 }

</bundles_post_ra>
